<compile_context>
chip_gen: v6e
topology: v6e:2x2x1
jax: 0.10.0
libtpu: 0.0.40
codegen_flags: <defaults>
</compile_context>

<pallas_src>
import numpy as np
import jax
import jax.numpy as jnp
from jax.experimental import pallas as pl
from jax.experimental.pallas import tpu as pltpu


def _round_up(x, m):
    return ((x + m - 1) // m) * m


def _choose_tiles(n_text, n_user, target_rows=512):
    """Pick sublane-aligned (tile_t, tile_u) with tile_t*tile_u ~ target_rows."""
    tile_u = min(_round_up(n_user, 8), 128)
    tile_t = min(_round_up(n_text, 8), max(8, _round_up(max(target_rows // tile_u, 1), 8)))
    # v7x has two TensorCores: keep the "parallel" grid at >= 2 steps when rows allow it.
    steps = (_round_up(n_text, tile_t) // tile_t) * (_round_up(n_user, tile_u) // tile_u)
    if steps < 2 and tile_t >= 16:
        tile_t = max(8, (tile_t // 2) // 8 * 8)
    return tile_t, tile_u


def dcn_kernel(text_ref, user_ref, wc_ref, bc_ref, weff_ref, beff_ref, out_ref, x0_ref):
    """One (text-tile, user-tile) grid step; weights stay VMEM-resident across the grid.

    text_ref : (tT, 2*Et)    f32   concat(text_min, text_max) rows for this text tile
    user_ref : (tU, Eu)      f32   user rows for this user tile
    wc_ref   : (L, Dp, Dp)   bf16  cross-layer weights, stored (in, out) = W^T, zero-padded
    bc_ref   : (L, 1, Dp)    f32   cross-layer biases, zero-padded
    weff_ref : (Dp, Op)      bf16  folded (linear stack + head) weight, zero-padded
    beff_ref : (1, Op)       f32   folded bias, zero-padded
    out_ref  : (tT, tU, Op)  f32
    x0_ref   : (tT*tU, Dp)   f32   VMEM scratch holding the x_0 row tile
    """
    tT, dt = text_ref.shape          # dt = 2*Et
    tU, du = user_ref.shape          # du = Eu
    rows, Dp = x0_ref.shape
    D = dt + du
    L = wc_ref.shape[0]

    # ---- build x_0 tile in VMEM: row (t*tU + u) = [text_feat[t] | user[u] | 0-pad] ----
    if D < Dp:
        x0_ref[:, D:] = jnp.zeros((rows, Dp - D), jnp.float32)
    user_tile = user_ref[...]
    for t in range(tT):                                   # static unroll; tT is small
        r = pl.ds(t * tU, tU)
        x0_ref[r, 0:dt] = jnp.broadcast_to(text_ref[pl.ds(t, 1), :], (tU, dt))
        x0_ref[r, dt:D] = user_tile
    x0 = x0_ref[...]                                      # (rows, Dp) f32

    # ---- DCN-V2 cross stack: bf16 matmul operands, f32 accumulation & elementwise ----
    c = x0
    for l in range(L):                                    # static unroll over cross layers
        lin = jnp.dot(c.astype(jnp.bfloat16), wc_ref[l],
                      preferred_element_type=jnp.float32) + bc_ref[l]
        c = x0 * lin + c

    # ---- folded (Identity linear stack + embedding head) affine map ----
    out = jnp.dot(c.astype(jnp.bfloat16), weff_ref[...],
                  preferred_element_type=jnp.float32) + beff_ref[...]

    # lane-dense store, one (tU, Op) slab per text row of the tile
    for t in range(tT):
        out_ref[t, :, :] = out[t * tU:(t + 1) * tU, :].astype(out_ref.dtype)


def dcn_forward(text_feat, user_feat, wc, bc, w_eff, b_eff, *, tile_t, tile_u):
    """text_feat: (Tp, 2Et) f32, user_feat: (Up, Eu) f32 -> (Tp, Up, Op) f32."""
    Tp, dt = text_feat.shape
    Up, du = user_feat.shape
    Dp = wc.shape[-1]
    Op = w_eff.shape[-1]
    grid = (Tp // tile_t, Up // tile_u)

    return pl.pallas_call(
        dcn_kernel,
        out_shape=jax.ShapeDtypeStruct((Tp, Up, Op), jnp.float32),
        grid=grid,
        in_specs=[
            pl.BlockSpec((tile_t, dt), lambda i, j: (i, 0)),     # text tile (varies with i)
            pl.BlockSpec((tile_u, du), lambda i, j: (0, j)),     # user tile (varies with j)
            pl.BlockSpec(wc.shape, lambda i, j: (0, 0, 0)),      # constant -> VMEM resident
            pl.BlockSpec(bc.shape, lambda i, j: (0, 0, 0)),
            pl.BlockSpec(w_eff.shape, lambda i, j: (0, 0)),
            pl.BlockSpec(b_eff.shape, lambda i, j: (0, 0)),
        ],
        out_specs=pl.BlockSpec((tile_t, tile_u, Op), lambda i, j: (i, j, 0)),
        scratch_shapes=[pltpu.VMEM((tile_t * tile_u, Dp), jnp.float32)],
        compiler_params=pltpu.CompilerParams(
            dimension_semantics=("parallel", "parallel"),
            vmem_limit_bytes=32 * 1024 * 1024,
        ),
    )(text_feat, user_feat, wc, bc, w_eff, b_eff)


class DeepCrossNetworkPallas:
    """JAX/Pallas port of argperspectives DeepCrossNetwork (stacked form, Identity act.)."""

    def __init__(self, user_embedding_length, output_shape, *, num_layers=3,
                 text_embedding_length=None, key=None):
        # TODO(synk): form='parallel', dense_feature_appendix and non-Identity activation
        # functions are not implemented (PyTorch defaults are stacked / None / None).
        self.user_embedding_length = int(user_embedding_length)
        self.text_embedding_length = int(text_embedding_length or user_embedding_length)
        self.output_shape = output_shape
        self.num_layers = int(num_layers)

        D = 2 * self.text_embedding_length + self.user_embedding_length
        O = output_shape if isinstance(output_shape, int) else int(np.prod(output_shape))
        self.D, self.O = D, O
        self.Dp = _round_up(D, 128)          # lane-dense feature width (do NOT pad to 256)
        self.Op = _round_up(O, 128)          # lane-dense output width

        if key is None:
            key = jax.random.PRNGKey(0)
        keys = iter(jax.random.split(key, 4 * self.num_layers + 2))

        def uniform(k, shape, fan_in):
            bound = 1.0 / float(np.sqrt(fan_in))
            return jax.random.uniform(k, shape, jnp.float32, -bound, bound)

        # Synthetic parameters with PyTorch-Linear-like init, stored as (in, out) = W^T.
        self.cross_w = [uniform(next(keys), (D, D), D) for _ in range(self.num_layers)]
        self.cross_b = [uniform(next(keys), (1, D), D) for _ in range(self.num_layers)]
        self.lin_w = [uniform(next(keys), (D, D), D) for _ in range(self.num_layers)]
        self.lin_b = [uniform(next(keys), (1, D), D) for _ in range(self.num_layers)]
        self.head_w = uniform(next(keys), (D, O), D)
        self.head_b = uniform(next(keys), (1, O), D)

        # ---- Fold Identity linear stack + head into one affine map (float64, exact). ----
        w_eff = np.eye(D, dtype=np.float64)
        b_eff = np.zeros((1, D), np.float64)
        for wl, bl in zip(self.lin_w, self.lin_b):
            wl64 = np.asarray(wl, np.float64)
            w_eff = w_eff @ wl64
            b_eff = b_eff @ wl64 + np.asarray(bl, np.float64)
        w_eff = w_eff @ np.asarray(self.head_w, np.float64)                  # (D, O)
        b_eff = b_eff @ np.asarray(self.head_w, np.float64) + np.asarray(self.head_b,
                                                                         np.float64)

        # ---- Zero-pad feature / output dims (exact: padded rows/cols/lanes are zero). ----
        L, Dp, Op = self.num_layers, self.Dp, self.Op
        wc_np = np.zeros((L, Dp, Dp), np.float32)
        wc_np[:, :D, :D] = np.stack([np.asarray(w, np.float32) for w in self.cross_w])
        bc_np = np.zeros((L, 1, Dp), np.float32)
        bc_np[:, :, :D] = np.stack([np.asarray(b, np.float32) for b in self.cross_b])
        weff_np = np.zeros((Dp, Op), np.float32)
        weff_np[:D, :O] = w_eff.astype(np.float32)
        beff_np = np.zeros((1, Op), np.float32)
        beff_np[:, :O] = b_eff.astype(np.float32)

        # Matmul operands in bf16 (native MXU path); biases stay f32 (added post-accum).
        self.wc_pad = jnp.asarray(wc_np).astype(jnp.bfloat16)
        self.bc_pad = jnp.asarray(bc_np)
        self.w_eff_pad = jnp.asarray(weff_np).astype(jnp.bfloat16)
        self.b_eff_pad = jnp.asarray(beff_np)

    # min_max_combine features: text_feat[t] = concat(text_min[t], text_max[t]); user rows.
    def _features(self, text_embeddings, user_embeddings):
        if isinstance(text_embeddings, (list, tuple)):
            stacked = jnp.stack([jnp.asarray(t, jnp.float32) for t in text_embeddings], 0)
            t_min = jnp.min(stacked, axis=0)
            t_max = jnp.max(stacked, axis=0)
        else:
            t_min = t_max = jnp.asarray(text_embeddings, jnp.float32)
        user = jnp.asarray(user_embeddings, jnp.float32)
        assert t_min.shape[-1] == self.text_embedding_length
        assert user.shape[-1] == self.user_embedding_length
        text_feat = jnp.concatenate([t_min, t_max], axis=-1)   # (T, 2*Et)
        return text_feat, user, t_min.shape[0], user.shape[0]

    def __call__(self, text_embeddings, user_embeddings):
        text_feat, user_feat, T, U = self._features(text_embeddings, user_embeddings)
        tile_t, tile_u = _choose_tiles(T, U)
        Tp, Up = _round_up(T, tile_t), _round_up(U, tile_u)
        if Tp != T:
            text_feat = jnp.pad(text_feat, ((0, Tp - T), (0, 0)))
        if Up != U:
            user_feat = jnp.pad(user_feat, ((0, Up - U), (0, 0)))

        out = dcn_forward(text_feat, user_feat, self.wc_pad, self.bc_pad,
                          self.w_eff_pad, self.b_eff_pad,
                          tile_t=tile_t, tile_u=tile_u)
        out = out[:T, :U, :self.O]
        if isinstance(self.output_shape, int):
            return out
        return out.reshape(T, U, *self.output_shape)

    # Pure-JAX reference: original (unfused, unpadded) layer structure, full-f32 matmuls.
    def reference(self, text_embeddings, user_embeddings):
        text_feat, user, T, U = self._features(text_embeddings, user_embeddings)
        Et, Eu = self.text_embedding_length, self.user_embedding_length
        x0 = jnp.concatenate([
            jnp.broadcast_to(text_feat[:, None, :], (T, U, 2 * Et)),
            jnp.broadcast_to(user[None, :, :], (T, U, Eu)),
        ], axis=-1)
        with jax.default_matmul_precision("highest"):
            c = x0
            for wc, bc in zip(self.cross_w, self.cross_b):
                c = x0 * (c @ wc + bc) + c
            h = c
            for wl, bl in zip(self.lin_w, self.lin_b):
                h = h @ wl + bl
            out = h @ self.head_w + self.head_b
        if isinstance(self.output_shape, int):
            return out
        return out.reshape(T, U, *self.output_shape)


if __name__ == "__main__":
    key = jax.random.PRNGKey(0)
    k_params, k_t0, k_t1, k_u = jax.random.split(key, 4)

    # Small module-consistent shapes: 16 texts x 16 users, embedding length 32, 3 classes.
    # Internal D = 2*32 + 32 = 96 (padded to 128 lanes in VMEM only), O = 3 (padded to 128).
    # Tiles: (tile_t, tile_u) = (8, 16) -> 128 rows/step, grid (2, 1) -> 2 parallel steps.
    E = 32
    T, U, O = 16, 16, 3

    model = DeepCrossNetworkPallas(user_embedding_length=E, output_shape=O,
                                   num_layers=3, key=k_params)

    # Two text-embedding tensors exercise the min/max branch of min_max_combine.
    text_a = jax.random.normal(k_t0, (T, E), jnp.float32)
    text_b = jax.random.normal(k_t1, (T, E), jnp.float32)
    users = jax.random.normal(k_u, (U, E), jnp.float32)

    out = model([text_a, text_b], users)
    out = jax.block_until_ready(out)

    assert out.shape == (T, U, O)
    assert out.dtype == jnp.float32

    ref = model.reference([text_a, text_b], users)
    # Tolerance covers the kernel's bf16 MXU operands (f32 accumulation / elementwise) and
    # the mathematically exact layer folding + zero padding, vs. an f32-HIGHEST reference.
    np.testing.assert_allclose(np.asarray(out), np.asarray(ref), rtol=2e-2, atol=2e-2)

    print("KERNEL_OK")
</pallas_src>

<mosaic_0001>
module attributes {stable_mosaic.version = 11 : i64} {
  func.func @dcn_kernel(%arg0: i32, %arg1: i32, %arg2: memref<8x64xf32, #tpu.memory_space<vmem>>, %arg3: memref<16x32xf32, #tpu.memory_space<vmem>>, %arg4: memref<3x128x128xbf16, #tpu.memory_space<vmem>>, %arg5: memref<3x1x128xf32, #tpu.memory_space<vmem>>, %arg6: memref<128x128xbf16, #tpu.memory_space<vmem>>, %arg7: memref<1x128xf32, #tpu.memory_space<vmem>>, %arg8: memref<8x16x128xf32, #tpu.memory_space<vmem>>, %arg9: memref<128x128xf32, #tpu.memory_space<vmem>>) attributes {dimension_semantics = [#tpu.dimension_semantics<parallel>, #tpu.dimension_semantics<parallel>], iteration_bounds = array<i64: 2, 1>, scalar_prefetch = 0 : i64, scratch_operands = 1 : i64, tpu.core_type = #tpu.core_type<tc>, window_params = [{transform_indices = @transform_0, window_bounds = array<i64: 8, 64>}, {transform_indices = @transform_1, window_bounds = array<i64: 16, 32>}, {pipeline_mode = #tpu.pipeline_mode<synchronous>, transform_indices = @transform_2, window_bounds = array<i64: 3, 128, 128>}, {pipeline_mode = #tpu.pipeline_mode<synchronous>, transform_indices = @transform_3, window_bounds = array<i64: 3, 1, 128>}, {pipeline_mode = #tpu.pipeline_mode<synchronous>, transform_indices = @transform_4, window_bounds = array<i64: 128, 128>}, {pipeline_mode = #tpu.pipeline_mode<synchronous>, transform_indices = @transform_5, window_bounds = array<i64: 1, 128>}, {transform_indices = @transform_6, window_bounds = array<i64: 8, 16, 128>}]} {
    %cst = arith.constant 0.000000e+00 : f32
    %0 = vector.broadcast %cst : f32 to vector<128x32xf32>
    %c0 = arith.constant 0 : index
    %c96 = arith.constant 96 : index
    %1 = vector.load %arg9[%c0, %c96] : memref<128x128xf32, #tpu.memory_space<vmem>>, vector<128x32xf32>
    tpu.vector_store %arg9[%c0, %c96], %0 {strides = array<i32>} : memref<128x128xf32, #tpu.memory_space<vmem>>, vector<128x32xf32>,
    %c0_0 = arith.constant 0 : index
    %c0_1 = arith.constant 0 : index
    %2 = vector.load %arg3[%c0_0, %c0_1] : memref<16x32xf32, #tpu.memory_space<vmem>>, vector<16x32xf32>
    %c0_2 = arith.constant 0 : index
    %c0_3 = arith.constant 0 : index
    %3 = vector.load %arg2[%c0_2, %c0_3] : memref<8x64xf32, #tpu.memory_space<vmem>>, vector<1x64xf32>
    %4 = vector.shape_cast %3 : vector<1x64xf32> to vector<1x64xf32>
    %5 = vector.broadcast %4 : vector<1x64xf32> to vector<16x64xf32>
    %c0_4 = arith.constant 0 : index
    %c0_5 = arith.constant 0 : index
    %6 = vector.load %arg9[%c0_4, %c0_5] : memref<128x128xf32, #tpu.memory_space<vmem>>, vector<16x64xf32>
    tpu.vector_store %arg9[%c0_4, %c0_5], %5 {strides = array<i32>} : memref<128x128xf32, #tpu.memory_space<vmem>>, vector<16x64xf32>,
    %c0_6 = arith.constant 0 : index
    %c64 = arith.constant 64 : index
    %7 = vector.load %arg9[%c0_6, %c64] : memref<128x128xf32, #tpu.memory_space<vmem>>, vector<16x32xf32>
    tpu.vector_store %arg9[%c0_6, %c64], %2 {strides = array<i32>} : memref<128x128xf32, #tpu.memory_space<vmem>>, vector<16x32xf32>,
    %c1 = arith.constant 1 : index
    %c0_7 = arith.constant 0 : index
    %8 = vector.load %arg2[%c1, %c0_7] : memref<8x64xf32, #tpu.memory_space<vmem>>, vector<1x64xf32>
    %9 = vector.shape_cast %8 : vector<1x64xf32> to vector<1x64xf32>
    %10 = vector.broadcast %9 : vector<1x64xf32> to vector<16x64xf32>
    %c16 = arith.constant 16 : index
    %c0_8 = arith.constant 0 : index
    %11 = vector.load %arg9[%c16, %c0_8] : memref<128x128xf32, #tpu.memory_space<vmem>>, vector<16x64xf32>
    tpu.vector_store %arg9[%c16, %c0_8], %10 {strides = array<i32>} : memref<128x128xf32, #tpu.memory_space<vmem>>, vector<16x64xf32>,
    %c16_9 = arith.constant 16 : index
    %c64_10 = arith.constant 64 : index
    %12 = vector.load %arg9[%c16_9, %c64_10] : memref<128x128xf32, #tpu.memory_space<vmem>>, vector<16x32xf32>
    tpu.vector_store %arg9[%c16_9, %c64_10], %2 {strides = array<i32>} : memref<128x128xf32, #tpu.memory_space<vmem>>, vector<16x32xf32>,
    %c2 = arith.constant 2 : index
    %c0_11 = arith.constant 0 : index
    %13 = vector.load %arg2[%c2, %c0_11] : memref<8x64xf32, #tpu.memory_space<vmem>>, vector<1x64xf32>
    %14 = vector.shape_cast %13 : vector<1x64xf32> to vector<1x64xf32>
    %15 = vector.broadcast %14 : vector<1x64xf32> to vector<16x64xf32>
    %c32 = arith.constant 32 : index
    %c0_12 = arith.constant 0 : index
    %16 = vector.load %arg9[%c32, %c0_12] : memref<128x128xf32, #tpu.memory_space<vmem>>, vector<16x64xf32>
    tpu.vector_store %arg9[%c32, %c0_12], %15 {strides = array<i32>} : memref<128x128xf32, #tpu.memory_space<vmem>>, vector<16x64xf32>,
    %c32_13 = arith.constant 32 : index
    %c64_14 = arith.constant 64 : index
    %17 = vector.load %arg9[%c32_13, %c64_14] : memref<128x128xf32, #tpu.memory_space<vmem>>, vector<16x32xf32>
    tpu.vector_store %arg9[%c32_13, %c64_14], %2 {strides = array<i32>} : memref<128x128xf32, #tpu.memory_space<vmem>>, vector<16x32xf32>,
    %c3 = arith.constant 3 : index
    %c0_15 = arith.constant 0 : index
    %18 = vector.load %arg2[%c3, %c0_15] : memref<8x64xf32, #tpu.memory_space<vmem>>, vector<1x64xf32>
    %19 = vector.shape_cast %18 : vector<1x64xf32> to vector<1x64xf32>
    %20 = vector.broadcast %19 : vector<1x64xf32> to vector<16x64xf32>
    %c48 = arith.constant 48 : index
    %c0_16 = arith.constant 0 : index
    %21 = vector.load %arg9[%c48, %c0_16] : memref<128x128xf32, #tpu.memory_space<vmem>>, vector<16x64xf32>
    tpu.vector_store %arg9[%c48, %c0_16], %20 {strides = array<i32>} : memref<128x128xf32, #tpu.memory_space<vmem>>, vector<16x64xf32>,
    %c48_17 = arith.constant 48 : index
    %c64_18 = arith.constant 64 : index
    %22 = vector.load %arg9[%c48_17, %c64_18] : memref<128x128xf32, #tpu.memory_space<vmem>>, vector<16x32xf32>
    tpu.vector_store %arg9[%c48_17, %c64_18], %2 {strides = array<i32>} : memref<128x128xf32, #tpu.memory_space<vmem>>, vector<16x32xf32>,
    %c4 = arith.constant 4 : index
    %c0_19 = arith.constant 0 : index
    %23 = vector.load %arg2[%c4, %c0_19] : memref<8x64xf32, #tpu.memory_space<vmem>>, vector<1x64xf32>
    %24 = vector.shape_cast %23 : vector<1x64xf32> to vector<1x64xf32>
    %25 = vector.broadcast %24 : vector<1x64xf32> to vector<16x64xf32>
    %c64_20 = arith.constant 64 : index
    %c0_21 = arith.constant 0 : index
    %26 = vector.load %arg9[%c64_20, %c0_21] : memref<128x128xf32, #tpu.memory_space<vmem>>, vector<16x64xf32>
    tpu.vector_store %arg9[%c64_20, %c0_21], %25 {strides = array<i32>} : memref<128x128xf32, #tpu.memory_space<vmem>>, vector<16x64xf32>,
    %c64_22 = arith.constant 64 : index
    %c64_23 = arith.constant 64 : index
    %27 = vector.load %arg9[%c64_22, %c64_23] : memref<128x128xf32, #tpu.memory_space<vmem>>, vector<16x32xf32>
    tpu.vector_store %arg9[%c64_22, %c64_23], %2 {strides = array<i32>} : memref<128x128xf32, #tpu.memory_space<vmem>>, vector<16x32xf32>,
    %c5 = arith.constant 5 : index
    %c0_24 = arith.constant 0 : index
    %28 = vector.load %arg2[%c5, %c0_24] : memref<8x64xf32, #tpu.memory_space<vmem>>, vector<1x64xf32>
    %29 = vector.shape_cast %28 : vector<1x64xf32> to vector<1x64xf32>
    %30 = vector.broadcast %29 : vector<1x64xf32> to vector<16x64xf32>
    %c80 = arith.constant 80 : index
    %c0_25 = arith.constant 0 : index
    %31 = vector.load %arg9[%c80, %c0_25] : memref<128x128xf32, #tpu.memory_space<vmem>>, vector<16x64xf32>
    tpu.vector_store %arg9[%c80, %c0_25], %30 {strides = array<i32>} : memref<128x128xf32, #tpu.memory_space<vmem>>, vector<16x64xf32>,
    %c80_26 = arith.constant 80 : index
    %c64_27 = arith.constant 64 : index
    %32 = vector.load %arg9[%c80_26, %c64_27] : memref<128x128xf32, #tpu.memory_space<vmem>>, vector<16x32xf32>
    tpu.vector_store %arg9[%c80_26, %c64_27], %2 {strides = array<i32>} : memref<128x128xf32, #tpu.memory_space<vmem>>, vector<16x32xf32>,
    %c6 = arith.constant 6 : index
    %c0_28 = arith.constant 0 : index
    %33 = vector.load %arg2[%c6, %c0_28] : memref<8x64xf32, #tpu.memory_space<vmem>>, vector<1x64xf32>
    %34 = vector.shape_cast %33 : vector<1x64xf32> to vector<1x64xf32>
    %35 = vector.broadcast %34 : vector<1x64xf32> to vector<16x64xf32>
    %c96_29 = arith.constant 96 : index
    %c0_30 = arith.constant 0 : index
    %36 = vector.load %arg9[%c96_29, %c0_30] : memref<128x128xf32, #tpu.memory_space<vmem>>, vector<16x64xf32>
    tpu.vector_store %arg9[%c96_29, %c0_30], %35 {strides = array<i32>} : memref<128x128xf32, #tpu.memory_space<vmem>>, vector<16x64xf32>,
    %c96_31 = arith.constant 96 : index
    %c64_32 = arith.constant 64 : index
    %37 = vector.load %arg9[%c96_31, %c64_32] : memref<128x128xf32, #tpu.memory_space<vmem>>, vector<16x32xf32>
    tpu.vector_store %arg9[%c96_31, %c64_32], %2 {strides = array<i32>} : memref<128x128xf32, #tpu.memory_space<vmem>>, vector<16x32xf32>,
    %c7 = arith.constant 7 : index
    %c0_33 = arith.constant 0 : index
    %38 = vector.load %arg2[%c7, %c0_33] : memref<8x64xf32, #tpu.memory_space<vmem>>, vector<1x64xf32>
    %39 = vector.shape_cast %38 : vector<1x64xf32> to vector<1x64xf32>
    %40 = vector.broadcast %39 : vector<1x64xf32> to vector<16x64xf32>
    %c112 = arith.constant 112 : index
    %c0_34 = arith.constant 0 : index
    %41 = vector.load %arg9[%c112, %c0_34] : memref<128x128xf32, #tpu.memory_space<vmem>>, vector<16x64xf32>
    tpu.vector_store %arg9[%c112, %c0_34], %40 {strides = array<i32>} : memref<128x128xf32, #tpu.memory_space<vmem>>, vector<16x64xf32>,
    %c112_35 = arith.constant 112 : index
    %c64_36 = arith.constant 64 : index
    %42 = vector.load %arg9[%c112_35, %c64_36] : memref<128x128xf32, #tpu.memory_space<vmem>>, vector<16x32xf32>
    tpu.vector_store %arg9[%c112_35, %c64_36], %2 {strides = array<i32>} : memref<128x128xf32, #tpu.memory_space<vmem>>, vector<16x32xf32>,
    %c0_37 = arith.constant 0 : index
    %c0_38 = arith.constant 0 : index
    %43 = vector.load %arg9[%c0_37, %c0_38] : memref<128x128xf32, #tpu.memory_space<vmem>>, vector<128x128xf32>
    %44 = arith.truncf %43 : vector<128x128xf32> to vector<128x128xbf16>
    %c0_39 = arith.constant 0 : index
    %c0_40 = arith.constant 0 : index
    %c0_41 = arith.constant 0 : index
    %45 = vector.load %arg4[%c0_39, %c0_40, %c0_41] : memref<3x128x128xbf16, #tpu.memory_space<vmem>>, vector<1x128x128xbf16>
    %46 = vector.shape_cast %45 : vector<1x128x128xbf16> to vector<128x128xbf16>
    %cst_42 = arith.constant dense<0.000000e+00> : vector<128x128xf32>
    %47 = tpu.matmul %44, %46, %cst_42 {dimension_numbers = #tpu.dot_dimension_numbers<[1], [0], [0], [1], [0, 0, 1, 1], [], []>} : vector<128x128xbf16>, vector<128x128xbf16>, vector<128x128xf32> -> vector<128x128xf32>
    %c0_43 = arith.constant 0 : index
    %c0_44 = arith.constant 0 : index
    %c0_45 = arith.constant 0 : index
    %48 = vector.load %arg5[%c0_43, %c0_44, %c0_45] : memref<3x1x128xf32, #tpu.memory_space<vmem>>, vector<1x1x128xf32>
    %49 = vector.shape_cast %48 : vector<1x1x128xf32> to vector<1x128xf32>
    %50 = vector.broadcast %49 : vector<1x128xf32> to vector<128x128xf32>
    %51 = arith.addf %47, %50 : vector<128x128xf32>
    %52 = arith.mulf %43, %51 : vector<128x128xf32>
    %53 = arith.addf %52, %43 : vector<128x128xf32>
    %54 = arith.truncf %53 : vector<128x128xf32> to vector<128x128xbf16>
    %c1_46 = arith.constant 1 : index
    %c0_47 = arith.constant 0 : index
    %c0_48 = arith.constant 0 : index
    %55 = vector.load %arg4[%c1_46, %c0_47, %c0_48] : memref<3x128x128xbf16, #tpu.memory_space<vmem>>, vector<1x128x128xbf16>
    %56 = vector.shape_cast %55 : vector<1x128x128xbf16> to vector<128x128xbf16>
    %cst_49 = arith.constant dense<0.000000e+00> : vector<128x128xf32>
    %57 = tpu.matmul %54, %56, %cst_49 {dimension_numbers = #tpu.dot_dimension_numbers<[1], [0], [0], [1], [0, 0, 1, 1], [], []>} : vector<128x128xbf16>, vector<128x128xbf16>, vector<128x128xf32> -> vector<128x128xf32>
    %c1_50 = arith.constant 1 : index
    %c0_51 = arith.constant 0 : index
    %c0_52 = arith.constant 0 : index
    %58 = vector.load %arg5[%c1_50, %c0_51, %c0_52] : memref<3x1x128xf32, #tpu.memory_space<vmem>>, vector<1x1x128xf32>
    %59 = vector.shape_cast %58 : vector<1x1x128xf32> to vector<1x128xf32>
    %60 = vector.broadcast %59 : vector<1x128xf32> to vector<128x128xf32>
    %61 = arith.addf %57, %60 : vector<128x128xf32>
    %62 = arith.mulf %43, %61 : vector<128x128xf32>
    %63 = arith.addf %62, %53 : vector<128x128xf32>
    %64 = arith.truncf %63 : vector<128x128xf32> to vector<128x128xbf16>
    %c2_53 = arith.constant 2 : index
    %c0_54 = arith.constant 0 : index
    %c0_55 = arith.constant 0 : index
    %65 = vector.load %arg4[%c2_53, %c0_54, %c0_55] : memref<3x128x128xbf16, #tpu.memory_space<vmem>>, vector<1x128x128xbf16>
    %66 = vector.shape_cast %65 : vector<1x128x128xbf16> to vector<128x128xbf16>
    %cst_56 = arith.constant dense<0.000000e+00> : vector<128x128xf32>
    %67 = tpu.matmul %64, %66, %cst_56 {dimension_numbers = #tpu.dot_dimension_numbers<[1], [0], [0], [1], [0, 0, 1, 1], [], []>} : vector<128x128xbf16>, vector<128x128xbf16>, vector<128x128xf32> -> vector<128x128xf32>
    %c2_57 = arith.constant 2 : index
    %c0_58 = arith.constant 0 : index
    %c0_59 = arith.constant 0 : index
    %68 = vector.load %arg5[%c2_57, %c0_58, %c0_59] : memref<3x1x128xf32, #tpu.memory_space<vmem>>, vector<1x1x128xf32>
    %69 = vector.shape_cast %68 : vector<1x1x128xf32> to vector<1x128xf32>
    %70 = vector.broadcast %69 : vector<1x128xf32> to vector<128x128xf32>
    %71 = arith.addf %67, %70 : vector<128x128xf32>
    %72 = arith.mulf %43, %71 : vector<128x128xf32>
    %73 = arith.addf %72, %63 : vector<128x128xf32>
    %74 = arith.truncf %73 : vector<128x128xf32> to vector<128x128xbf16>
    %c0_60 = arith.constant 0 : index
    %c0_61 = arith.constant 0 : index
    %75 = vector.load %arg6[%c0_60, %c0_61] : memref<128x128xbf16, #tpu.memory_space<vmem>>, vector<128x128xbf16>
    %cst_62 = arith.constant dense<0.000000e+00> : vector<128x128xf32>
    %76 = tpu.matmul %74, %75, %cst_62 {dimension_numbers = #tpu.dot_dimension_numbers<[1], [0], [0], [1], [0, 0, 1, 1], [], []>} : vector<128x128xbf16>, vector<128x128xbf16>, vector<128x128xf32> -> vector<128x128xf32>
    %c0_63 = arith.constant 0 : index
    %c0_64 = arith.constant 0 : index
    %77 = vector.load %arg7[%c0_63, %c0_64] : memref<1x128xf32, #tpu.memory_space<vmem>>, vector<1x128xf32>
    %78 = vector.broadcast %77 : vector<1x128xf32> to vector<128x128xf32>
    %79 = arith.addf %76, %78 : vector<128x128xf32>
    %80 = vector.extract_strided_slice %79 {offsets = [0, 0], sizes = [16, 128], strides = [1, 1]} : vector<128x128xf32> to vector<16x128xf32>
    %c0_65 = arith.constant 0 : index
    %c0_66 = arith.constant 0 : index
    %c0_67 = arith.constant 0 : index
    %81 = vector.load %arg8[%c0_65, %c0_66, %c0_67] : memref<8x16x128xf32, #tpu.memory_space<vmem>>, vector<1x16x128xf32>
    %82 = vector.shape_cast %81 : vector<1x16x128xf32> to vector<16x128xf32>
    %83 = vector.shape_cast %80 : vector<16x128xf32> to vector<1x16x128xf32>
    tpu.vector_store %arg8[%c0_65, %c0_66, %c0_67], %83 {strides = array<i32>} : memref<8x16x128xf32, #tpu.memory_space<vmem>>, vector<1x16x128xf32>,
    %84 = vector.extract_strided_slice %79 {offsets = [16, 0], sizes = [16, 128], strides = [1, 1]} : vector<128x128xf32> to vector<16x128xf32>
    %c1_68 = arith.constant 1 : index
    %c0_69 = arith.constant 0 : index
    %c0_70 = arith.constant 0 : index
    %85 = vector.load %arg8[%c1_68, %c0_69, %c0_70] : memref<8x16x128xf32, #tpu.memory_space<vmem>>, vector<1x16x128xf32>
    %86 = vector.shape_cast %85 : vector<1x16x128xf32> to vector<16x128xf32>
    %87 = vector.shape_cast %84 : vector<16x128xf32> to vector<1x16x128xf32>
    tpu.vector_store %arg8[%c1_68, %c0_69, %c0_70], %87 {strides = array<i32>} : memref<8x16x128xf32, #tpu.memory_space<vmem>>, vector<1x16x128xf32>,
    %88 = vector.extract_strided_slice %79 {offsets = [32, 0], sizes = [16, 128], strides = [1, 1]} : vector<128x128xf32> to vector<16x128xf32>
    %c2_71 = arith.constant 2 : index
    %c0_72 = arith.constant 0 : index
    %c0_73 = arith.constant 0 : index
    %89 = vector.load %arg8[%c2_71, %c0_72, %c0_73] : memref<8x16x128xf32, #tpu.memory_space<vmem>>, vector<1x16x128xf32>
    %90 = vector.shape_cast %89 : vector<1x16x128xf32> to vector<16x128xf32>
    %91 = vector.shape_cast %88 : vector<16x128xf32> to vector<1x16x128xf32>
    tpu.vector_store %arg8[%c2_71, %c0_72, %c0_73], %91 {strides = array<i32>} : memref<8x16x128xf32, #tpu.memory_space<vmem>>, vector<1x16x128xf32>,
    %92 = vector.extract_strided_slice %79 {offsets = [48, 0], sizes = [16, 128], strides = [1, 1]} : vector<128x128xf32> to vector<16x128xf32>
    %c3_74 = arith.constant 3 : index
    %c0_75 = arith.constant 0 : index
    %c0_76 = arith.constant 0 : index
    %93 = vector.load %arg8[%c3_74, %c0_75, %c0_76] : memref<8x16x128xf32, #tpu.memory_space<vmem>>, vector<1x16x128xf32>
    %94 = vector.shape_cast %93 : vector<1x16x128xf32> to vector<16x128xf32>
    %95 = vector.shape_cast %92 : vector<16x128xf32> to vector<1x16x128xf32>
    tpu.vector_store %arg8[%c3_74, %c0_75, %c0_76], %95 {strides = array<i32>} : memref<8x16x128xf32, #tpu.memory_space<vmem>>, vector<1x16x128xf32>,
    %96 = vector.extract_strided_slice %79 {offsets = [64, 0], sizes = [16, 128], strides = [1, 1]} : vector<128x128xf32> to vector<16x128xf32>
    %c4_77 = arith.constant 4 : index
    %c0_78 = arith.constant 0 : index
    %c0_79 = arith.constant 0 : index
    %97 = vector.load %arg8[%c4_77, %c0_78, %c0_79] : memref<8x16x128xf32, #tpu.memory_space<vmem>>, vector<1x16x128xf32>
    %98 = vector.shape_cast %97 : vector<1x16x128xf32> to vector<16x128xf32>
    %99 = vector.shape_cast %96 : vector<16x128xf32> to vector<1x16x128xf32>
    tpu.vector_store %arg8[%c4_77, %c0_78, %c0_79], %99 {strides = array<i32>} : memref<8x16x128xf32, #tpu.memory_space<vmem>>, vector<1x16x128xf32>,
    %100 = vector.extract_strided_slice %79 {offsets = [80, 0], sizes = [16, 128], strides = [1, 1]} : vector<128x128xf32> to vector<16x128xf32>
    %c5_80 = arith.constant 5 : index
    %c0_81 = arith.constant 0 : index
    %c0_82 = arith.constant 0 : index
    %101 = vector.load %arg8[%c5_80, %c0_81, %c0_82] : memref<8x16x128xf32, #tpu.memory_space<vmem>>, vector<1x16x128xf32>
    %102 = vector.shape_cast %101 : vector<1x16x128xf32> to vector<16x128xf32>
    %103 = vector.shape_cast %100 : vector<16x128xf32> to vector<1x16x128xf32>
    tpu.vector_store %arg8[%c5_80, %c0_81, %c0_82], %103 {strides = array<i32>} : memref<8x16x128xf32, #tpu.memory_space<vmem>>, vector<1x16x128xf32>,
    %104 = vector.extract_strided_slice %79 {offsets = [96, 0], sizes = [16, 128], strides = [1, 1]} : vector<128x128xf32> to vector<16x128xf32>
    %c6_83 = arith.constant 6 : index
    %c0_84 = arith.constant 0 : index
    %c0_85 = arith.constant 0 : index
    %105 = vector.load %arg8[%c6_83, %c0_84, %c0_85] : memref<8x16x128xf32, #tpu.memory_space<vmem>>, vector<1x16x128xf32>
    %106 = vector.shape_cast %105 : vector<1x16x128xf32> to vector<16x128xf32>
    %107 = vector.shape_cast %104 : vector<16x128xf32> to vector<1x16x128xf32>
    tpu.vector_store %arg8[%c6_83, %c0_84, %c0_85], %107 {strides = array<i32>} : memref<8x16x128xf32, #tpu.memory_space<vmem>>, vector<1x16x128xf32>,
    %108 = vector.extract_strided_slice %79 {offsets = [112, 0], sizes = [16, 128], strides = [1, 1]} : vector<128x128xf32> to vector<16x128xf32>
    %c7_86 = arith.constant 7 : index
    %c0_87 = arith.constant 0 : index
    %c0_88 = arith.constant 0 : index
    %109 = vector.load %arg8[%c7_86, %c0_87, %c0_88] : memref<8x16x128xf32, #tpu.memory_space<vmem>>, vector<1x16x128xf32>
    %110 = vector.shape_cast %109 : vector<1x16x128xf32> to vector<16x128xf32>
    %111 = vector.shape_cast %108 : vector<16x128xf32> to vector<1x16x128xf32>
    tpu.vector_store %arg8[%c7_86, %c0_87, %c0_88], %111 {strides = array<i32>} : memref<8x16x128xf32, #tpu.memory_space<vmem>>, vector<1x16x128xf32>,
    return
  }
  func.func @transform_0(%arg0: i32, %arg1: i32) -> (i32, i32) {
    %c0_i32 = arith.constant 0 : i32
    %c0_i32_0 = arith.constant 0 : i32
    return %arg0, %c0_i32 : i32, i32
  }
  func.func @transform_1(%arg0: i32, %arg1: i32) -> (i32, i32) {
    %c0_i32 = arith.constant 0 : i32
    %c0_i32_0 = arith.constant 0 : i32
    return %c0_i32, %arg1 : i32, i32
  }
  func.func @transform_2(%arg0: i32, %arg1: i32) -> (i32, i32, i32) {
    %c0_i32 = arith.constant 0 : i32
    %c0_i32_0 = arith.constant 0 : i32
    %c0_i32_1 = arith.constant 0 : i32
    %c0_i32_2 = arith.constant 0 : i32
    return %c0_i32, %c0_i32_0, %c0_i32_1 : i32, i32, i32
  }
  func.func @transform_3(%arg0: i32, %arg1: i32) -> (i32, i32, i32) {
    %c0_i32 = arith.constant 0 : i32
    %c0_i32_0 = arith.constant 0 : i32
    %c0_i32_1 = arith.constant 0 : i32
    %c0_i32_2 = arith.constant 0 : i32
    return %c0_i32, %c0_i32_0, %c0_i32_1 : i32, i32, i32
  }
  func.func @transform_4(%arg0: i32, %arg1: i32) -> (i32, i32) {
    %c0_i32 = arith.constant 0 : i32
    %c0_i32_0 = arith.constant 0 : i32
    %c0_i32_1 = arith.constant 0 : i32
    return %c0_i32, %c0_i32_0 : i32, i32
  }
  func.func @transform_5(%arg0: i32, %arg1: i32) -> (i32, i32) {
    %c0_i32 = arith.constant 0 : i32
    %c0_i32_0 = arith.constant 0 : i32
    %c0_i32_1 = arith.constant 0 : i32
    return %c0_i32, %c0_i32_0 : i32, i32
  }
  func.func @transform_6(%arg0: i32, %arg1: i32) -> (i32, i32, i32) {
    %c0_i32 = arith.constant 0 : i32
    %c0_i32_0 = arith.constant 0 : i32
    return %arg0, %arg1, %c0_i32 : i32, i32, i32
  }
}

</mosaic_0001>

<bundles_post_ra>
// kernel: tpu_custom_call.1
= control target key start
LH: loop header
LB: loop body
LE: loop exit
PB: predicated region body
PF: predicated region fallthrough
CT: control target
= control target key end

     0   :  { %s2651_s0 = inlined_call_operand.hbm [shape: f32[16,64], index: 0, kind: input, shape index: {}]   ;;  %s2652_s1 = inlined_call_operand.hbm [shape: f32[16,32], index: 1, kind: input, shape index: {}]   ;;  %s2653_s2 = inlined_call_operand.hbm [shape: bf16[3,128,128], index: 2, kind: input, shape index: {}]   ;;  %s2654_s3 = inlined_call_operand.vmem [shape: f32[3,1,128], index: 3, kind: input, shape index: {}]   ;;  %s2655_s4 = inlined_call_operand.hbm [shape: bf16[128,128], index: 4, kind: input, shape index: {}]   ;;  %s2656_s5 = inlined_call_operand.vmem [shape: f32[1,128], index: 5, kind: input, shape index: {}]   ;;  %s2657_s6 = inlined_call_operand.hbm [shape: f32[16,16,128], index: 6, kind: output, shape index: {}]  }
   0x1   :  { %2661 = sst [smem:[#allocation16_spill]] %s2652_s1 }
   0x2   :  { %2662 = sst [smem:[#allocation17_spill]] %s2653_s2 }
   0x3   :  { %2663 = sst [smem:[#allocation18_spill]] %s2655_s4 }
   0x4   :  { %11 = vsyncpa [#allocation4], 0 }
   0x5   :  { %13 = vsyncpa [#allocation4 + $0x1], 0 }
   0x6   :  { %14 = vsyncpa [#allocation7], 0 }
   0x7   :  { %15 = vsyncpa [#allocation10], 0 }
   0x8   :  { %16 = vsyncpa [#allocation5], 0 }
   0x9   :  { %18 = vsyncpa [#allocation5 + $0x1], 0  ;;  %s2063_s21 = smov 0   ;;  %s2065_s22 = smov 0  }
   0xa   :  { %s2067_s23 = smov 0   ;;  %s2069_s24 = smov 0  }
   0xb   :  { %s2071_s25 = smov 0   ;;  %s2073_s26 = smov 0  }
   0xc LB: > { %s1411_s27 = sadd.s32 4294967295, %s2013_s26   ;;  %s1412_s28 = sadd.s32 4294967294, %s2013_s26   ;;  %s2013_s26 = sphi %s2073_s26, %s24_s26   ;;  %s2009_s25 = sphi %s2071_s25, %s2684_s25   ;;  %s2005_s24 = sphi %s2069_s24, %s2683_s24   ;;  %s2001_s23 = sphi %s2067_s23, %s2682_s23   ;;  %s1997_s22 = sphi %s2065_s22, %s2681_s22   ;;  %s1993_s21 = sphi %s2063_s21, %s2680_s21  }
   0xd   : > { %p56_p0 = scmp.ne.s32.totalorder %s1997_s22, %s1993_s21  ;;  %p2097_p1 = scmp.eq.s32.totalorder %s1411_s27, 0 }
   0xe   : > { %p2101_p2 = scmp.eq.s32.totalorder %s1411_s27, 1  ;;  %p198_p3 = scmp.eq.s32.totalorder %s1412_s28, 1 }
   0xf   : > { %s2664_s29 = scalar_select %p2097_p1, 1, 0 }
  0x10   : > { %p2107_p4 = por %p2097_p1, %p56_p0  ;;  %p1413_p5 = scmp.ge.s32.totalorder %s2013_s26, 1 }
  0x11   : > { %p2112_p6 = por %p198_p3, %p56_p0  ;;  %p205_p7 = scmp.lt.s32.totalorder %s2013_s26, 3 }
  0x12   : > { %s2666_s7 = scalar_select %p2107_p4, 1, 0 }
  0x13   : > { %s2667_s8 = scalar_select %p2112_p6, 1, 0 }
  0x14   : > { %p2117_p8 = pnand %p1413_p5, %p205_p7  ;;  %s2015_s10 = smov [#allocation6]  }
  0x15   : > { %s219_s11 = sshll.u32 %s2015_s10, 4  ;;  %s2016_s13 = smov [#allocation8]   ;;  %s220_s11 = int_to_ptr.vmem [resolvable:$true] %s219_s11 }
  0x16   : > { %p1702_p9 = pneg %p2117_p8  ;;  %s232_s14 = sshll.u32 %s2016_s13, 4  ;;  %s233_s14 = int_to_ptr.vmem [resolvable:$true] %s232_s14 }
  0x17   : > { %s1830_s15 = scalar_lea.vmem %s220_s11, 256  ;;  %p1838_p5 = scmp.lt.s32.totalorder %s220_s11, %s220_s11 }
  0x18   : > { %p2126_p11 = pnand %p1702_p9, %p2097_p1  ;;  %p1831_p13 = scmp.ne.s32.totalorder %s220_s11, %s1830_s15 }
  0x19   : > { %p1839_p7 = scmp.lt.s32.totalorder %s1830_s15, %s1830_s15 }
  0x1a   : > { %p1821_p12 = pneg %p2126_p11 }
  0x1b   : > { %p1840_p10 = por %p1839_p7, %p1838_p5 }
  0x1c   : > { %p1833_p0 = pnand %p1831_p13, %p1821_p12 }
  0x1e   : > { %p1834_p3 = pneg %p1833_p0 }
  0x20   : > { %p1841_p9 = pnand %p1840_p10, %p1834_p3 }
  0x22   : > { %1844 = shalt.err (!%p1841_p9)
}
  0x23   : > { %s2017_s16 = smov 128   ;;  %s2018_s17 = smov 8  }
  0x24   : > { %s2670_s1 = sld [smem:[#allocation16_spill]]  ;;  %s1856_s20 = scalar_lea.vmem %s233_s14, 3072 }
  0x25   : > { %p1857_p6 = scmp.ne.s32.totalorder %s233_s14, %s1856_s20  ;;  %p1864_p1 = scmp.lt.s32.totalorder %s233_s14, %s233_s14 }
  0x26   : > { %p1865_p4 = scmp.lt.s32.totalorder %s1856_s20, %s1856_s20 }
  0x27   : > { %p1859_p13 = pnand %p1857_p6, %p1821_p12 }
  0x28   : > { %p1866_p5 = por %p1865_p4, %p1864_p1 }
  0x29   : > { %p1860_p0 = pneg %p1859_p13 }
  0x2a   : > { %1705 = dma.hbm_to_vmem [thread:$0]  (!%p2126_p11), %s2670_s1, 256, %s220_s11, [#allocation7], %s2017_s16, %s2017_s16, %s2018_s17  }
  0x2b   : > { %p1867_p10 = pnand %p1866_p5, %p1860_p0 }
  0x2d   : > { %1870 = shalt.err (!%p1867_p10)
}
  0x2e   : > { %s2019_s27 = smov 64   ;;  %s2020_s28 = smov 4  }
  0x2f   : > { %s2671_s2 = sld [smem:[#allocation17_spill]]  ;;  %s2021_s11 = smov [#allocation9]  }
  0x30   : > { %s248_s15 = sshll.u32 %s2021_s11, 4  ;;  %s249_s15 = int_to_ptr.vmem [resolvable:$true] %s248_s15 }
  0x31   : > { %s1882_s16 = scalar_lea.vmem %s249_s15, 1024  ;;  %p1890_p4 = scmp.lt.s32.totalorder %s249_s15, %s249_s15 }
  0x32   : > { %p1883_p6 = scmp.ne.s32.totalorder %s249_s15, %s1882_s16  ;;  %p1891_p7 = scmp.lt.s32.totalorder %s1882_s16, %s1882_s16 }
  0x34   : > { %p1885_p3 = pnand %p1883_p6, %p1821_p12  ;;  %p1892_p9 = por %p1891_p7, %p1890_p4 }
  0x35   : > { %1708 = dma.hbm_to_vmem [thread:$0]  (!%p2126_p11), %s2671_s2, 3072, %s233_s14, [#allocation7], %s2019_s27, %s2019_s27, %s2020_s28  }
  0x36   : > { %p1886_p1 = pneg %p1885_p3 }
  0x38   : > { %p1893_p13 = pnand %p1892_p9, %p1886_p1 }
  0x3a   : > { %1896 = shalt.err (!%p1893_p13)
}
  0x3b   : > { %s2672_s4 = sld [smem:[#allocation18_spill]]  ;;  %s36_s14 = sadd.s32 1, %s2009_s25 }
  0x3c   : > { %p38_p12 = scmp.ge.s32.totalorder %s36_s14, 2  ;;  %s43_s19 = sadd.s32 1, %s2001_s23 }
  0x3d   : > { %p50_p0 = scmp.ne.s32.totalorder %s2001_s23, %s1997_s22  ;;  %p51_p5 = scmp.eq.s32.totalorder %s2013_s26, 0 }
  0x3e   : > { %s2686_s14 = smov (%p38_p12, %s36_s14), 0  ;;  %s1419_s11 = sshll.u32 %s2009_s25, 7 }
  0x3f   : > { %p2163_p10 = por %p51_p5, %p50_p0  ;;  %p2169_p6 = por %p2101_p2, %p50_p0 }
  0x40   : > { %s40_s10 = ssub.s32 %s2009_s25, %s2686_s14  ;;  %s274_s17 = scalar_lea.hbm %s2651_s0, %s1419_s11 }
  0x41   : > { %1711 = dma.hbm_to_vmem [thread:$0]  (!%p2126_p11), %s2672_s4, 1024, %s249_s15, [#allocation10], %s2019_s27, %s2019_s27, %s2020_s28  }
  0x42   : > { %p1723_p11 = scmp.lt.s32.totalorder %s2013_s26, 2  ;;  %p41_p3 = scmp.eq.s32.totalorder %s40_s10, 0 }
  0x43   : > { %s265_s27 = sand.u32 1, %s2001_s23  }
  0x44   : > { %s1418_s28 = sshll.u32 %s265_s27, 3  ;;  %p2186_p2 = pnand %p1723_p11, %p2163_p10 }
  0x45   : > { %s2178_s13 = scalar_select %p41_p3, %s2001_s23, %s43_s19  }
  0x46   : > { %s269_s18 = scalar_lea.vmem [#allocation3], %s1418_s28  ;;  %s266_s2 = scalar_lea.sflag [#allocation4], %s265_s27 }
  0x47   : > { %s276_s1 = sshll.u32 %s269_s18, 4  ;;  %p1899_p1 = pneg %p2186_p2  ;;  %s277_s1 = int_to_ptr.vmem [resolvable:$true] %s276_s1 }
  0x48   : > { %s1910_s10 = scalar_lea.vmem %s277_s1, 128  ;;  %s2022_s19 = smov [#allocation3]  }
  0x49   : > { %p1911_p4 = scmp.ne.s32.totalorder %s277_s1, %s1910_s10  ;;  %s1915_s4 = sshll.u32 %s2022_s19, 4  ;;  %s1916_s4 = int_to_ptr.vmem [resolvable:$false] %s1915_s4 }
  0x4a   : > { %s1917_s11 = scalar_lea.vmem %s1916_s4, 256  ;;  %p1918_p13 = scmp.lt.s32.totalorder %s277_s1, %s1916_s4 }
  0x4b   : > { %p1913_p7 = pnand %p1911_p4, %p1899_p1  ;;  %p1919_p12 = scmp.lt.s32.totalorder %s1917_s11, %s1910_s10 }
  0x4d   : > { %p1914_p9 = pneg %p1913_p7  ;;  %p1920_p0 = por %p1919_p12, %p1918_p13 }
  0x4f   : > { %p1921_p5 = pnand %p1920_p0, %p1914_p9 }
  0x51   : > { %1924 = shalt.err (!%p1921_p5)
}
  0x52   : > { %1715 = dma.hbm_to_vmem [thread:$0]  (!%p2186_p2), %s274_s17, 128, %s277_s1, %s266_s2  }
  0x53   : > { %285 = sbr.rel (%p2117_p8) target bundleno = 1089 (0x441), region = 44  ;;  %s2197_s12 = sand.u32 (!%p2117_p8), 1, %s1997_s22  }
  0x54   : > { %s1421_s27 = sshll.u32 (!%p2117_p8), %s2197_s12, 3  ;;  %s288_s28 = scalar_lea.sflag (!%p2117_p8), [#allocation4], %s2197_s12 }
  0x55   : > { %s2201_s15 = scalar_lea.vmem (!%p2117_p8), [#allocation3], %s1421_s27  ;;  %p2676_p10 = scmp.ne.s32.totalorder (!%p2117_p8), %s2666_s7, 0 }
  0x58   : > { %1976 = dma.done.wait (%p2676_p10), %s288_s28, 128  }
  0x59   : > { %1978 = vsyncadd (%p2676_p10), %s288_s28, 4294967168  ;;  %p2677_p11 = scmp.ne.s32.totalorder %s2664_s29, 0 }
  0x5b   : > { %1980 = dma.done.wait (%p2677_p11), [#allocation7], 3328  }
  0x5c   : > { %1982 = vsyncadd (%p2677_p11), [#allocation7], 4294963968 }
  0x5d   : > { %1984 = dma.done.wait (%p2677_p11), [#allocation10], 1024  }
  0x5e   : > { %1986 = vsyncadd (%p2677_p11), [#allocation10], 4294966272  ;;  %vm335_vm0 = vcmask 1048320   ;;  %v2023_v0 = vmov 0.0   ;;  %v352_v1 = vld [vmem:[#allocation6] sm:$0xff]  ;;  %v353_v2 = vld [vmem:[#allocation6 + $0x8] sm:$0xff] }
  0x5f   : > { %336 = vst.msk [vmem:[#allocation2] sm:$0xff] %vm335_vm0, %v2023_v0  ;;  %338 = vst.msk [vmem:[#allocation2 + $0x10] sm:$0xff] %vm335_vm0, %v2023_v0  ;;  %s2024_s1 = smov 64   ;;  %v1787_v3 = vld [vmem:[#allocation8 + $0x38] sm:$0xff]   ;;  %v1788_v4 = vld [vmem:[#allocation8 + $0x30] sm:$0xff]   ;;  %vm359_vm1 = vcmask 523264  }
  0x60   : > { %340 = vst.msk [vmem:[#allocation2 + $0x20] sm:$0xff] %vm335_vm0, %v2023_v0  ;;  %342 = vst.msk [vmem:[#allocation2 + $0x30] sm:$0xff] %vm335_vm0, %v2023_v0  ;;  %364 = vrot.lane.b32.xlu0 %v352_v1, %s2024_s1  ;;  %1558 = vmatprep.subr.bf16.mxu0 %v1787_v3  ;;  %v1789_v5 = vld [vmem:[#allocation8 + $0x28] sm:$0xff]   ;;  %v1790_v14 = vld [vmem:[#allocation8 + $0x20] sm:$0xff]   ;;  %vm370_vm2 = vcmask 785920   ;;  %s1425_s17 = sshll.u32 %s2197_s12, 7 }
  0x61   : > { %344 = vst.msk [vmem:[#allocation2 + $0x40] sm:$0xff] %vm335_vm0, %v2023_v0  ;;  %346 = vst.msk [vmem:[#allocation2 + $0x50] sm:$0xff] %vm335_vm0, %v2023_v0  ;;  %1559 = vmatpush3.bf16.msra.mxu0 %v1787_v3  ;;  %v1426_v6 = vld [vmem:[%s2201_s15] ss:$0 sm:$0xff]  ;;  %v1427_v7 = vld [vmem:[%s2201_s15 + $0x1] ss:$0 sm:$0xff] }
  0x62   : > { %348 = vst.msk [vmem:[#allocation2 + $0x60] sm:$0xff] %vm335_vm0, %v2023_v0  ;;  %350 = vst.msk [vmem:[#allocation2 + $0x70] sm:$0xff] %vm335_vm0, %v2023_v0  ;;  %1560 = vmatprep.subr.bf16.mxu0 %v1788_v4  ;;  %v1428_v8 = vld [vmem:[%s2201_s15 + $0x2] ss:$0 sm:$0xff]  ;;  %v1429_v9 = vld [vmem:[%s2201_s15 + $0x3] ss:$0 sm:$0xff] }
  0x63   : > { %337 = vst.msk [vmem:[#allocation2 + $0x8] sm:$0xff] %vm335_vm0, %v2023_v0  ;;  %339 = vst.msk [vmem:[#allocation2 + $0x18] sm:$0xff] %vm335_vm0, %v2023_v0  ;;  %v1430_v10 = vld [vmem:[%s2201_s15 + $0x4] ss:$0 sm:$0xff]  ;;  %v1431_v11 = vld [vmem:[%s2201_s15 + $0x5] ss:$0 sm:$0xff] }
  0x64   : > { %341 = vst.msk [vmem:[#allocation2 + $0x28] sm:$0xff] %vm335_vm0, %v2023_v0  ;;  %343 = vst.msk [vmem:[#allocation2 + $0x38] sm:$0xff] %vm335_vm0, %v2023_v0  ;;  %366 = vrot.lane.b32.xlu0 %v353_v2, %s2024_s1  ;;  %v1432_v12 = vld [vmem:[%s2201_s15 + $0x6] ss:$0 sm:$0xff]  ;;  %v1433_v13 = vld [vmem:[%s2201_s15 + $0x7] ss:$0 sm:$0xff] }
  0x65   : > { %345 = vst.msk [vmem:[#allocation2 + $0x48] sm:$0xff] %vm335_vm0, %v2023_v0  ;;  %347 = vst.msk [vmem:[#allocation2 + $0x58] sm:$0xff] %vm335_vm0, %v2023_v0  ;;  %1561 = vmatpush3.bf16.msra.mxu0 %v1788_v4  ;;  %v1791_v15 = vld [vmem:[#allocation8 + $0x18] sm:$0xff]   ;;  %v1792_v16 = vld [vmem:[#allocation8 + $0x10] sm:$0xff]   ;;  %s2578_s10 = scalar_lea.vmem [#allocation11], %s1425_s17  ;;  %s1493_s19 = sshll.u32 %s2005_s24, 11 }
  0x66   : > { %349 = vst.msk [vmem:[#allocation2 + $0x68] sm:$0xff] %vm335_vm0, %v2023_v0  ;;  %351 = vst.msk [vmem:[#allocation2 + $0x78] sm:$0xff] %vm335_vm0, %v2023_v0  ;;  %1562 = vmatprep.subr.bf16.mxu0 %v1789_v5  ;;  %v1793_v17 = vld [vmem:[#allocation8 + $0x8] sm:$0xff]   ;;  %v1794_v18 = vld [vmem:[#allocation8] sm:$0xff]   ;;  %s1296_s11 = sshll.u32 %s2578_s10, 4  ;;  %s2599_s15 = scalar_lea.hbm %s2657_s6, %s1493_s19  ;;  %s2601_s11 = int_to_ptr.vmem [resolvable:$true] %s1296_s11 }
  0x67   : > { %360 = vst.msk [vmem:[#allocation2] sm:$0xff] %vm359_vm1, %v1426_v6  ;;  %361 = vst.msk [vmem:[#allocation2 + $0x8] sm:$0xff] %vm359_vm1, %v1426_v6  ;;  %v1795_v19 = vld [vmem:[#allocation8 + $0x78] sm:$0xff]   ;;  %v1796_v20 = vld [vmem:[#allocation8 + $0x70] sm:$0xff]   ;;  %s1280_s1 = scalar_lea.sflag [#allocation5], %s2197_s12  ;;  %s1925_s24 = scalar_lea.vmem %s2601_s11, 2048 }
  0x68   : > { %378 = vst.msk [vmem:[#allocation2 + $0x10] sm:$0xff] %vm359_vm1, %v1427_v7  ;;  %387 = vst.msk [vmem:[#allocation2 + $0x20] sm:$0xff] %vm359_vm1, %v1428_v8  ;;  %1590 = vmatprep.subr.bf16.mxu1 %v1795_v19  ;;  %v1797_v21 = vld [vmem:[#allocation8 + $0x68] sm:$0xff]   ;;  %v1798_v22 = vld [vmem:[#allocation8 + $0x60] sm:$0xff]   ;;  %p1926_p8 = scmp.ne.s32.totalorder %s2601_s11, %s1925_s24  ;;  %s2025_s2 = smov [#allocation11]  }
  0x69   : > { %396 = vst.msk [vmem:[#allocation2 + $0x30] sm:$0xff] %vm359_vm1, %v1429_v9  ;;  %379 = vst.msk [vmem:[#allocation2 + $0x18] sm:$0xff] %vm359_vm1, %v1427_v7  ;;  %1563 = vmatpush3.bf16.msra.mxu0 %v1789_v5  ;;  %1591 = vmatpush3.bf16.msra.mxu1 %v1795_v19  ;;  %v1799_v49 = vld [vmem:[#allocation8 + $0x58] sm:$0xff]   ;;  %v1800_v50 = vld [vmem:[#allocation8 + $0x50] sm:$0xff]   ;;  %s1929_s4 = sshll.u32 %s2025_s2, 4  ;;  %s1930_s4 = int_to_ptr.vmem [resolvable:$false] %s1929_s4 }
  0x6a   : > { %388 = vst.msk [vmem:[#allocation2 + $0x28] sm:$0xff] %vm359_vm1, %v1428_v8  ;;  %397 = vst.msk [vmem:[#allocation2 + $0x38] sm:$0xff] %vm359_vm1, %v1429_v9  ;;  %1564 = vmatprep.subr.bf16.mxu0 %v1790_v14  ;;  %1592 = vmatprep.subr.bf16.mxu1 %v1796_v20  ;;  %v1801_v51 = vld [vmem:[#allocation8 + $0x48] sm:$0xff]   ;;  %v1802_v52 = vld [vmem:[#allocation8 + $0x40] sm:$0xff]   ;;  %p1927_p3 = pnand %p1926_p8, %p2169_p6  ;;  %s1931_s29 = scalar_lea.vmem %s1930_s4, 4096 }
  0x6b   : > { %405 = vst.msk [vmem:[#allocation2 + $0x40] sm:$0xff] %vm359_vm1, %v1430_v10  ;;  %414 = vst.msk [vmem:[#allocation2 + $0x50] sm:$0xff] %vm359_vm1, %v1431_v11  ;;  %v1803_v53 = vld [vmem:[#allocation8 + $0xb8] sm:$0xff]   ;;  %v1804_v54 = vld [vmem:[#allocation8 + $0xb0] sm:$0xff]   ;;  %p1932_p1 = scmp.lt.s32.totalorder %s2601_s11, %s1930_s4  ;;  %p1933_p4 = scmp.lt.s32.totalorder %s1931_s29, %s1925_s24 }
  0x6c   : > { %423 = vst.msk [vmem:[#allocation2 + $0x60] sm:$0xff] %vm359_vm1, %v1432_v12  ;;  %406 = vst.msk [vmem:[#allocation2 + $0x48] sm:$0xff] %vm359_vm1, %v1430_v10  ;;  %v1805_v55 = vld [vmem:[#allocation8 + $0xa8] sm:$0xff]   ;;  %v1806_v56 = vld [vmem:[#allocation8 + $0xa0] sm:$0xff]   ;;  %p1928_p2 = pneg %p1927_p3 }
  0x6d   : > { %415 = vst.msk [vmem:[#allocation2 + $0x58] sm:$0xff] %vm359_vm1, %v1431_v11  ;;  %424 = vst.msk [vmem:[#allocation2 + $0x68] sm:$0xff] %vm359_vm1, %v1432_v12  ;;  %1565 = vmatpush3.bf16.msra.mxu0 %v1790_v14  ;;  %1593 = vmatpush3.bf16.msra.mxu1 %v1796_v20  ;;  %v1807_v57 = vld [vmem:[#allocation8 + $0x98] sm:$0xff]   ;;  %v2322_v59 = vld [vmem:[%s2654_s3] ss:$0 sm:$0xff]  ;;  %p1934_p7 = por %p1933_p4, %p1932_p1 }
  0x6e   : > { %432 = vst.msk [vmem:[#allocation2 + $0x70] sm:$0xff] %vm359_vm1, %v1433_v13  ;;  %433 = vst.msk [vmem:[#allocation2 + $0x78] sm:$0xff] %vm359_vm1, %v1433_v13  ;;  %1566 = vmatprep.subr.bf16.mxu0 %v1791_v15  ;;  %1594 = vmatprep.subr.bf16.mxu1 %v1797_v21 }
  0x6f   : > { %p1935_p9 = pnand %p1934_p7, %p1928_p2 }
  0x71   : > { %1567 = vmatpush3.bf16.msra.mxu0 %v1791_v15  ;;  %1595 = vmatpush3.bf16.msra.mxu1 %v1797_v21 }
  0x72   : > { %1568 = vmatprep.subr.bf16.mxu0 %v1792_v16  ;;  %1596 = vmatprep.subr.bf16.mxu1 %v1798_v22 }
  0x75   : > { %1569 = vmatpush3.bf16.msra.mxu0 %v1792_v16  ;;  %1597 = vmatpush3.bf16.msra.mxu1 %v1798_v22 }
  0x76   : > { %1570 = vmatprep.subr.bf16.mxu0 %v1793_v17  ;;  %1598 = vmatprep.subr.bf16.mxu1 %v1799_v49 }
  0x79   : > { %1571 = vmatpush3.bf16.msra.mxu0 %v1793_v17  ;;  %1599 = vmatpush3.bf16.msra.mxu1 %v1799_v49 }
  0x7a   : > { %1572 = vmatprep.subr.bf16.mxu0 %v1794_v18  ;;  %1600 = vmatprep.subr.bf16.mxu1 %v1800_v50 }
  0x7d   : > { %1573 = vmatpush3.bf16.msra.mxu0 %v1794_v18  ;;  %1601 = vmatpush3.bf16.msra.mxu1 %v1800_v50 }
  0x7e   : > { %1602 = vmatprep.subr.bf16.mxu1 %v1801_v51  ;;  %1622 = vmatprep.subr.bf16.mxu0 %v1803_v53 }
  0x81   : > { %1603 = vmatpush3.bf16.msra.mxu1 %v1801_v51 }
  0x82   : > { %1604 = vmatprep.subr.bf16.mxu1 %v1802_v52 }
  0x85   : > { %1605 = vmatpush3.bf16.msra.mxu1 %v1802_v52 }
  0xd2   : > { %v365_v23 = vpop.permute.xlu0 %364 }
  0xd3   : > { %371 = vst.msk [vmem:[#allocation2] sm:$0xff] %vm370_vm2, %v365_v23  ;;  %380 = vst.msk [vmem:[#allocation2 + $0x10] sm:$0xff] %vm370_vm2, %v365_v23 }
  0xd4   : > { %389 = vst.msk [vmem:[#allocation2 + $0x20] sm:$0xff] %vm370_vm2, %v365_v23  ;;  %398 = vst.msk [vmem:[#allocation2 + $0x30] sm:$0xff] %vm370_vm2, %v365_v23 }
  0xd5   : > { %407 = vst.msk [vmem:[#allocation2 + $0x40] sm:$0xff] %vm370_vm2, %v365_v23  ;;  %416 = vst.msk [vmem:[#allocation2 + $0x50] sm:$0xff] %vm370_vm2, %v365_v23 }
  0xd6   : > { %425 = vst.msk [vmem:[#allocation2 + $0x60] sm:$0xff] %vm370_vm2, %v365_v23  ;;  %434 = vst.msk [vmem:[#allocation2 + $0x70] sm:$0xff] %vm370_vm2, %v365_v23  ;;  %v367_v24 = vpop.permute.xlu0 %366 }
  0xd7   : > { %372 = vst.msk [vmem:[#allocation2 + $0x8] sm:$0xff] %vm370_vm2, %v367_v24  ;;  %381 = vst.msk [vmem:[#allocation2 + $0x18] sm:$0xff] %vm370_vm2, %v367_v24 }
  0xd8   : > { %390 = vst.msk [vmem:[#allocation2 + $0x28] sm:$0xff] %vm370_vm2, %v367_v24  ;;  %399 = vst.msk [vmem:[#allocation2 + $0x38] sm:$0xff] %vm370_vm2, %v367_v24 }
  0xd9   : > { %408 = vst.msk [vmem:[#allocation2 + $0x48] sm:$0xff] %vm370_vm2, %v367_v24  ;;  %417 = vst.msk [vmem:[#allocation2 + $0x58] sm:$0xff] %vm370_vm2, %v367_v24 }
  0xda   : > { %426 = vst.msk [vmem:[#allocation2 + $0x68] sm:$0xff] %vm370_vm2, %v367_v24  ;;  %435 = vst.msk [vmem:[#allocation2 + $0x78] sm:$0xff] %vm370_vm2, %v367_v24  ;;  %v2271_v25 = vld [vmem:[#allocation2] sm:$0xff]  ;;  %v2273_v26 = vld [vmem:[#allocation2 + $0x10] sm:$0xff] }
  0xdb   : > { %v2285_v32 = vld [vmem:[#allocation2 + $0x20] sm:$0xff]  ;;  %v2293_v36 = vld [vmem:[#allocation2 + $0x30] sm:$0xff] }
  0xdc   : > { %v2297_v38 = vld [vmem:[#allocation2 + $0x40] sm:$0xff]  ;;  %v2305_v42 = vld [vmem:[#allocation2 + $0x50] sm:$0xff] }
  0xdd   : > { %v2309_v44 = vld [vmem:[#allocation2 + $0x60] sm:$0xff]  ;;  %v2315_v47 = vld [vmem:[#allocation2 + $0x70] sm:$0xff] }
  0xde   : > { %v2275_v27 = vld [vmem:[#allocation2 + $0x8] sm:$0xff]  ;;  %v2277_v28 = vld [vmem:[#allocation2 + $0x18] sm:$0xff] }
  0xdf   : > { %v2279_v29 = vld [vmem:[#allocation2 + $0x28] sm:$0xff]  ;;  %v452_v30 = vpack.c.bf16 %v2275_v27, %v2271_v25  ;;  %v453_v31 = vpack.c.bf16 %v2277_v28, %v2273_v26  ;;  %v2289_v34 = vld [vmem:[#allocation2 + $0x38] sm:$0xff] }
  0xe0   : > { %v454_v33 = vpack.c.bf16 %v2279_v29, %v2285_v32  ;;  %v2291_v35 = vld [vmem:[#allocation2 + $0x48] sm:$0xff]  ;;  %v455_v37 = vpack.c.bf16 %v2289_v34, %v2293_v36  ;;  %v2301_v40 = vld [vmem:[#allocation2 + $0x58] sm:$0xff] }
  0xe1   : > { %1574 = vmatprep.mubr.bf16.mxu0 %v452_v30  ;;  %v456_v39 = vpack.c.bf16 %v2291_v35, %v2297_v38  ;;  %v2303_v41 = vld [vmem:[#allocation2 + $0x68] sm:$0xff]  ;;  %v457_v43 = vpack.c.bf16 %v2301_v40, %v2305_v42  ;;  %v2313_v46 = vld [vmem:[#allocation2 + $0x78] sm:$0xff] }
  0xe2   : > { %1575 = vmatmul.mubr.bf16.vlgmr.msra.gmra.mxu0 %v453_v31  ;;  %v458_v45 = vpack.c.bf16 %v2303_v41, %v2309_v44  ;;  %v459_v48 = vpack.c.bf16 %v2313_v46, %v2315_v47 }
  0xe3   : > { %1578 = vmatprep.mubr.bf16.mxu0 %v454_v33  ;;  %1623 = vmatpush3.bf16.msra.mxu0 %v1803_v53 }
  0xe4   : > { %1624 = vmatprep.subr.bf16.mxu0 %v1804_v54 }
  0xe7   : > { %1625 = vmatpush3.bf16.msra.mxu0 %v1804_v54 }
  0xe8   : > { %1626 = vmatprep.subr.bf16.mxu0 %v1805_v55 }
  0xea   : > { %1579 = vmatmul.mubr.bf16.gmra.mxu0 %v455_v37 }
  0xeb   : > { %1582 = vmatprep.mubr.bf16.mxu0 %v456_v39  ;;  %1627 = vmatpush3.bf16.msra.mxu0 %v1805_v55 }
  0xec   : > { %1628 = vmatprep.subr.bf16.mxu0 %v1806_v56 }
  0xef   : > { %1629 = vmatpush3.bf16.msra.mxu0 %v1806_v56 }
  0xf0   : > { %1630 = vmatprep.subr.bf16.mxu0 %v1807_v57 }
  0xf2   : > { %1583 = vmatmul.mubr.bf16.gmra.mxu0 %v457_v43 }
  0xf3   : > { %1586 = vmatprep.mubr.bf16.mxu0 %v458_v45  ;;  %1631 = vmatpush3.bf16.msra.mxu0 %v1807_v57 }
  0xfa   : > { %1587 = vmatmul.mubr.bf16.gmra.mxu0 %v459_v48 }
 0x1a2   : > { %v1576_v58 = vpop.f32.mrf.mxu0 }
 0x1a3   : > { %v574_v62 = vadd.f32 %v1576_v58, %v2322_v59 }
 0x1a4   : > { %v565_v60 = vpop.f32.mrf.mxu0 }
 0x1a5   : > { %v566_v61 = vadd.f32 %v2322_v59, %v565_v60  ;;  %v630_v5 = vmul.f32 %v574_v62, %v2273_v26 }
 0x1a6   : > { %v1577_v63 = vpop.f32.mrf.mxu0 }
 0x1a7   : > { %v577_v0 = vadd.f32 %v1577_v63, %v2322_v59  ;;  %v628_v2 = vmul.f32 %v566_v61, %v2271_v25  ;;  %v2343_v13 = vadd.f32 %v630_v5, %v2273_v26 }
 0x1a8   : > { %v568_v1 = vpop.f32.mrf.mxu0 }
 0x1a9   : > { %v631_v3 = vmul.f32 %v577_v0, %v2277_v28  ;;  %v569_v4 = vadd.f32 %v2322_v59, %v568_v1  ;;  %v2337_v11 = vadd.f32 %v628_v2, %v2271_v25 }
 0x1aa   : > { %v1580_v6 = vpop.f32.mrf.mxu0 }
 0x1ab   : > { %v629_v7 = vmul.f32 %v569_v4, %v2275_v27  ;;  %v2333_v8 = vadd.f32 %v631_v3, %v2277_v28  ;;  %v590_v14 = vadd.f32 %v1580_v6, %v2322_v59 }
 0x1ac   : > { %v581_v9 = vpop.f32.mrf.mxu0 }
 0x1ad   : > { %v582_v10 = vadd.f32 %v2322_v59, %v581_v9  ;;  %v2340_v12 = vadd.f32 %v629_v7, %v2275_v27  ;;  %v661_v19 = vpack.c.bf16 %v2333_v8, %v2343_v13  ;;  %v634_v23 = vmul.f32 %v590_v14, %v2293_v36 }
 0x1ae   : > { %v1581_v15 = vpop.f32.mrf.mxu0 }
 0x1af   : > { %v593_v16 = vadd.f32 %v1581_v15, %v2322_v59  ;;  %v660_v17 = vpack.c.bf16 %v2340_v12, %v2337_v11  ;;  %v632_v20 = vmul.f32 %v582_v10, %v2285_v32  ;;  %v2367_v45 = vadd.f32 %v634_v23, %v2293_v36  ;;  %v1808_v23 = vld [vmem:[#allocation8 + $0x90] sm:$0xff]  }
 0x1b0   : > { %v584_v18 = vpop.f32.mrf.mxu0  ;;  %1632 = vmatprep.subr.bf16.mxu0 %v1808_v23 }
 0x1b1   : > { %v635_v21 = vmul.f32 %v593_v16, %v2289_v34  ;;  %v585_v22 = vadd.f32 %v2322_v59, %v584_v18  ;;  %1606 = vmatprep.mubr.bf16.mxu1 %v660_v17  ;;  %v2360_v37 = vadd.f32 %v632_v20, %v2285_v32  ;;  %1633 = vmatpush3.bf16.msra.mxu0 %v1808_v23 }
 0x1b2   : > { %v1584_v24 = vpop.f32.mrf.mxu0  ;;  %1607 = vmatmul.mubr.bf16.vlgmr.msra.gmra.mxu1 %v661_v19 }
 0x1b3   : > { %v633_v30 = vmul.f32 %v585_v22, %v2279_v29  ;;  %v2357_v31 = vadd.f32 %v635_v21, %v2289_v34  ;;  %v606_v48 = vadd.f32 %v1584_v24, %v2322_v59  ;;  %v1809_v24 = vld [vmem:[#allocation8 + $0x88] sm:$0xff]  }
 0x1b4   : > { %v597_v33 = vpop.f32.mrf.mxu0  ;;  %1634 = vmatprep.subr.bf16.mxu0 %v1809_v24 }
 0x1b5   : > { %v2363_v39 = vadd.f32 %v633_v30, %v2279_v29  ;;  %v598_v43 = vadd.f32 %v2322_v59, %v597_v33  ;;  %v663_v53 = vpack.c.bf16 %v2357_v31, %v2367_v45  ;;  %v638_v57 = vmul.f32 %v606_v48, %v2305_v42  ;;  %1635 = vmatpush3.bf16.msra.mxu0 %v1809_v24  ;;  %v1810_v30 = vld [vmem:[#allocation8 + $0x80] sm:$0xff]   ;;  %v1811_v33 = vld [vmem:[#allocation9 + $0x38] sm:$0xff]   ;;  %v1813_v48 = vld [vmem:[#allocation9 + $0x28] sm:$0xff]  }
 0x1b6   : > { %v1585_v49 = vpop.f32.mrf.mxu0  ;;  %1636 = vmatprep.subr.bf16.mxu0 %v1810_v30  ;;  %1654 = vmatprep.subr.bf16.mxu1 %v1811_v33 }
 0x1b7   : > { %v609_v50 = vadd.f32 %v1585_v49, %v2322_v59  ;;  %v662_v51 = vpack.c.bf16 %v2363_v39, %v2360_v37  ;;  %v636_v54 = vmul.f32 %v598_v43, %v2297_v38  ;;  %v2391_v2 = vadd.f32 %v638_v57, %v2305_v42  ;;  %v1812_v43 = vld [vmem:[#allocation9 + $0x30] sm:$0xff]   ;;  %1655 = vmatpush3.bf16.msra.mxu1 %v1811_v33  ;;  %v1814_v49 = vld [vmem:[#allocation9 + $0x20] sm:$0xff]  }
 0x1b8   : > { %v600_v52 = vpop.f32.mrf.mxu0  ;;  %1656 = vmatprep.subr.bf16.mxu1 %v1812_v43 }
 0x1b9   : > { %v639_v55 = vmul.f32 %v609_v50, %v2301_v40  ;;  %v601_v56 = vadd.f32 %v2322_v59, %v600_v52  ;;  %1610 = vmatprep.mubr.bf16.mxu1 %v662_v51  ;;  %v2384_v63 = vadd.f32 %v636_v54, %v2297_v38  ;;  %1637 = vmatpush3.bf16.msra.mxu0 %v1810_v30  ;;  %v1815_v50 = vld [vmem:[#allocation9 + $0x18] sm:$0xff]   ;;  %v2423_v52 = vld [vmem:[%s2654_s3 + $0x1] ss:$0 sm:$0xff] }
 0x1ba   : > { %v1588_v58 = vpop.f32.mrf.mxu0  ;;  %1611 = vmatmul.mubr.bf16.gmra.mxu1 %v663_v53 }
 0x1bb   : > { %v637_v60 = vmul.f32 %v601_v56, %v2291_v35  ;;  %v2381_v61 = vadd.f32 %v639_v55, %v2301_v40  ;;  %v622_v3 = vadd.f32 %v1588_v58, %v2322_v59  ;;  %1657 = vmatpush3.bf16.msra.mxu1 %v1812_v43 }
 0x1bc   : > { %v613_v62 = vpop.f32.mrf.mxu0  ;;  %1658 = vmatprep.subr.bf16.mxu1 %v1813_v48 }
 0x1bd   : > { %v2387_v0 = vadd.f32 %v637_v60, %v2291_v35  ;;  %v614_v1 = vadd.f32 %v2322_v59, %v613_v62  ;;  %v665_v9 = vpack.c.bf16 %v2381_v61, %v2391_v2  ;;  %v642_v16 = vmul.f32 %v622_v3, %v2315_v47 }
 0x1be   : > { %v1589_v4 = vpop.f32.mrf.mxu0 }
 0x1bf   : > { %v625_v5 = vadd.f32 %v1589_v4, %v2322_v59  ;;  %v664_v6 = vpack.c.bf16 %v2387_v0, %v2384_v63  ;;  %v640_v10 = vmul.f32 %v614_v1, %v2309_v44  ;;  %v2414_v21 = vadd.f32 %v642_v16, %v2315_v47  ;;  %1659 = vmatpush3.bf16.msra.mxu1 %v1813_v48 }
 0x1c0   : > { %v616_v7 = vpop.f32.mrf.mxu0  ;;  %1660 = vmatprep.subr.bf16.mxu1 %v1814_v49 }
 0x1c1   : > { %v643_v14 = vmul.f32 %v625_v5, %v2313_v46  ;;  %v617_v15 = vadd.f32 %v2322_v59, %v616_v7  ;;  %1614 = vmatprep.mubr.bf16.mxu1 %v664_v6  ;;  %v2408_v19 = vadd.f32 %v640_v10, %v2309_v44 }
 0x1c2   : > { %1615 = vmatmul.mubr.bf16.gmra.mxu1 %v665_v9 }
 0x1c3   : > { %v641_v17 = vmul.f32 %v617_v15, %v2303_v41  ;;  %v2405_v18 = vadd.f32 %v643_v14, %v2313_v46  ;;  %1661 = vmatpush3.bf16.msra.mxu1 %v1814_v49 }
 0x1c4   : > { %1662 = vmatprep.subr.bf16.mxu1 %v1815_v50 }
 0x1c5   : > { %v2411_v20 = vadd.f32 %v641_v17, %v2303_v41  ;;  %v667_v22 = vpack.c.bf16 %v2405_v18, %v2414_v21 }
 0x1c7   : > { %v666_v59 = vpack.c.bf16 %v2411_v20, %v2408_v19  ;;  %1663 = vmatpush3.bf16.msra.mxu1 %v1815_v50 }
 0x1c9   : > { %1618 = vmatprep.mubr.bf16.mxu1 %v666_v59 }
 0x1ca   : > { %1619 = vmatmul.mubr.bf16.gmra.mxu1 %v667_v22 }
 0x272   : > { %v1608_v51 = vpop.f32.mrf.mxu1 }
 0x273   : > { %v784_v55 = vadd.f32 %v1608_v51, %v2423_v52 }
 0x274   : > { %v775_v53 = vpop.f32.mrf.mxu1 }
 0x275   : > { %v776_v54 = vadd.f32 %v2423_v52, %v775_v53  ;;  %v840_v3 = vmul.f32 %v784_v55, %v2273_v26 }
 0x276   : > { %v1609_v56 = vpop.f32.mrf.mxu1 }
 0x277   : > { %v787_v57 = vadd.f32 %v1609_v56, %v2423_v52  ;;  %v838_v60 = vmul.f32 %v776_v54, %v2271_v25  ;;  %v2444_v15 = vadd.f32 %v840_v3, %v2343_v13 }
 0x278   : > { %v778_v58 = vpop.f32.mrf.mxu1 }
 0x279   : > { %v841_v62 = vmul.f32 %v787_v57, %v2277_v28  ;;  %v779_v1 = vadd.f32 %v2423_v52, %v778_v58  ;;  %v2437_v9 = vadd.f32 %v838_v60, %v2337_v11 }
 0x27a   : > { %v1612_v4 = vpop.f32.mrf.mxu1 }
 0x27b   : > { %v839_v5 = vmul.f32 %v779_v1, %v2275_v27  ;;  %v2434_v6 = vadd.f32 %v841_v62, %v2333_v8  ;;  %v800_v16 = vadd.f32 %v1612_v4, %v2423_v52 }
 0x27c   : > { %v791_v7 = vpop.f32.mrf.mxu1 }
 0x27d   : > { %v2440_v10 = vadd.f32 %v839_v5, %v2340_v12  ;;  %v792_v14 = vadd.f32 %v2423_v52, %v791_v7  ;;  %v871_v11 = vpack.c.bf16 %v2434_v6, %v2444_v15  ;;  %v844_v13 = vmul.f32 %v800_v16, %v2293_v36 }
 0x27e   : > { %v1613_v17 = vpop.f32.mrf.mxu1 }
 0x27f   : > { %v803_v59 = vadd.f32 %v1613_v17, %v2423_v52  ;;  %v870_v8 = vpack.c.bf16 %v2440_v10, %v2437_v9  ;;  %v842_v12 = vmul.f32 %v792_v14, %v2285_v32  ;;  %v2468_v53 = vadd.f32 %v844_v13, %v2367_v45 }
 0x280   : > { %v794_v22 = vpop.f32.mrf.mxu1 }
 0x281   : > { %v845_v23 = vmul.f32 %v803_v59, %v2289_v34  ;;  %v795_v24 = vadd.f32 %v2423_v52, %v794_v22  ;;  %1638 = vmatprep.mubr.bf16.mxu0 %v870_v8  ;;  %v2461_v49 = vadd.f32 %v842_v12, %v2360_v37 }
 0x282   : > { %v1616_v30 = vpop.f32.mrf.mxu1  ;;  %1639 = vmatmul.mubr.bf16.vlgmr.msra.gmra.mxu0 %v871_v11 }
 0x283   : > { %v843_v33 = vmul.f32 %v795_v24, %v2279_v29  ;;  %v2458_v43 = vadd.f32 %v845_v23, %v2357_v31  ;;  %v816_v54 = vadd.f32 %v1616_v30, %v2423_v52 }
 0x284   : > { %v807_v48 = vpop.f32.mrf.mxu1 }
 0x285   : > { %v2464_v50 = vadd.f32 %v843_v33, %v2363_v39  ;;  %v808_v51 = vadd.f32 %v2423_v52, %v807_v48  ;;  %v873_v37 = vpack.c.bf16 %v2458_v43, %v2468_v53  ;;  %v848_v45 = vmul.f32 %v816_v54, %v2305_v42 }
 0x286   : > { %v1617_v55 = vpop.f32.mrf.mxu1 }
 0x287   : > { %v819_v56 = vadd.f32 %v1617_v55, %v2423_v52  ;;  %v872_v31 = vpack.c.bf16 %v2464_v50, %v2461_v49  ;;  %v846_v39 = vmul.f32 %v808_v51, %v2297_v38  ;;  %v2492_v16 = vadd.f32 %v848_v45, %v2391_v2  ;;  %v1816_v51 = vld [vmem:[#allocation9 + $0x10] sm:$0xff]  }
 0x288   : > { %v810_v57 = vpop.f32.mrf.mxu1  ;;  %1664 = vmatprep.subr.bf16.mxu1 %v1816_v51 }
 0x289   : > { %v849_v58 = vmul.f32 %v819_v56, %v2301_v40  ;;  %v811_v60 = vadd.f32 %v2423_v52, %v810_v57  ;;  %1642 = vmatprep.mubr.bf16.mxu0 %v872_v31  ;;  %v2485_v5 = vadd.f32 %v846_v39, %v2384_v63  ;;  %1665 = vmatpush3.bf16.msra.mxu1 %v1816_v51 }
 0x28a   : > { %v1620_v62 = vpop.f32.mrf.mxu1  ;;  %1643 = vmatmul.mubr.bf16.gmra.mxu0 %v873_v37 }
 0x28b   : > { %v847_v1 = vmul.f32 %v811_v60, %v2291_v35  ;;  %v2482_v3 = vadd.f32 %v849_v58, %v2381_v61  ;;  %v832_v17 = vadd.f32 %v1620_v62, %v2423_v52 }
 0x28c   : > { %v823_v4 = vpop.f32.mrf.mxu1 }
 0x28d   : > { %v2488_v7 = vadd.f32 %v847_v1, %v2387_v0  ;;  %v824_v14 = vadd.f32 %v2423_v52, %v823_v4  ;;  %v875_v63 = vpack.c.bf16 %v2482_v3, %v2492_v16  ;;  %v852_v2 = vmul.f32 %v832_v17, %v2315_v47 }
 0x28e   : > { %v1621_v59 = vpop.f32.mrf.mxu1 }
 0x28f   : > { %v835_v8 = vadd.f32 %v1621_v59, %v2423_v52  ;;  %v874_v61 = vpack.c.bf16 %v2488_v7, %v2485_v5  ;;  %v850_v0 = vmul.f32 %v824_v14, %v2309_v44  ;;  %v2515_v33 = vadd.f32 %v852_v2, %v2414_v21  ;;  %v2524_v21 = vld [vmem:[%s2654_s3 + $0x2] ss:$0 sm:$0xff] }
 0x290   : > { %v826_v11 = vpop.f32.mrf.mxu1 }
 0x291   : > { %v853_v22 = vmul.f32 %v835_v8, %v2313_v46  ;;  %v827_v12 = vadd.f32 %v2423_v52, %v826_v11  ;;  %1646 = vmatprep.mubr.bf16.mxu0 %v874_v61  ;;  %v2509_v13 = vadd.f32 %v850_v0, %v2408_v19  ;;  %v1818_v19 = vld [vmem:[#allocation9] sm:$0xff]  }
 0x292   : > { %1647 = vmatmul.mubr.bf16.gmra.mxu0 %v875_v63 }
 0x293   : > { %v851_v23 = vmul.f32 %v827_v12, %v2303_v41  ;;  %v2506_v24 = vadd.f32 %v853_v22, %v2405_v18  ;;  %v1817_v18 = vld [vmem:[#allocation9 + $0x8] sm:$0xff]  }
 0x294   : > { %1666 = vmatprep.subr.bf16.mxu1 %v1817_v18 }
 0x295   : > { %v2512_v30 = vadd.f32 %v851_v23, %v2411_v20  ;;  %v877_v48 = vpack.c.bf16 %v2506_v24, %v2515_v33  ;;  %1667 = vmatpush3.bf16.msra.mxu1 %v1817_v18 }
 0x296   : > { %1668 = vmatprep.subr.bf16.mxu1 %v1818_v19 }
 0x297   : > { %v876_v52 = vpack.c.bf16 %v2512_v30, %v2509_v13 }
 0x299   : > { %1650 = vmatprep.mubr.bf16.mxu0 %v876_v52  ;;  %1669 = vmatpush3.bf16.msra.mxu1 %v1818_v19 }
 0x29a   : > { %1651 = vmatmul.mubr.bf16.gmra.mxu0 %v877_v48 }
 0x342   : > { %v1640_v20 = vpop.f32.mrf.mxu0 }
 0x343   : > { %v994_v56 = vadd.f32 %v1640_v20, %v2524_v21 }
 0x344   : > { %v985_v54 = vpop.f32.mrf.mxu0 }
 0x345   : > { %v986_v55 = vadd.f32 %v2524_v21, %v985_v54  ;;  %v1050_v45 = vmul.f32 %v994_v56, %v2273_v26 }
 0x346   : > { %v1641_v31 = vpop.f32.mrf.mxu0 }
 0x347   : > { %v997_v57 = vadd.f32 %v1641_v31, %v2524_v21  ;;  %v1048_v39 = vmul.f32 %v986_v55, %v2271_v25  ;;  %v1066_v25 = vadd.f32 %v1050_v45, %v2444_v15 }
 0x348   : > { %v988_v37 = vpop.f32.mrf.mxu0 }
 0x349   : > { %v1051_v58 = vmul.f32 %v997_v57, %v2277_v28  ;;  %v989_v60 = vadd.f32 %v2524_v21, %v988_v37  ;;  %v1064_v17 = vadd.f32 %v1048_v39, %v2437_v9 }
 0x34a   : > { %v1644_v62 = vpop.f32.mrf.mxu0 }
 0x34b   : > { %v1049_v1 = vmul.f32 %v989_v60, %v2275_v27  ;;  %v1067_v4 = vadd.f32 %v1051_v58, %v2434_v6  ;;  %v1010_v28 = vadd.f32 %v1644_v62, %v2524_v21 }
 0x34c   : > { %v1001_v14 = vpop.f32.mrf.mxu0 }
 0x34d   : > { %v1065_v59 = vadd.f32 %v1049_v1, %v2440_v10  ;;  %v1002_v8 = vadd.f32 %v2524_v21, %v1001_v14  ;;  %v1081_v63 = vpack.c.bf16 %v1067_v4, %v1066_v25  ;;  %v1054_v10 = vmul.f32 %v1010_v28, %v2293_v36 }
 0x34e   : > { %v1645_v61 = vpop.f32.mrf.mxu0 }
 0x34f   : > { %v1013_v11 = vadd.f32 %v1645_v61, %v2524_v21  ;;  %v1080_v26 = vpack.c.bf16 %v1065_v59, %v1064_v17  ;;  %v1052_v27 = vmul.f32 %v1002_v8, %v2285_v32 }
 0x350   : > { %v1004_v0 = vpop.f32.mrf.mxu0 }
 0x351   : > { %v1055_v6 = vmul.f32 %v1013_v11, %v2289_v34  ;;  %v1005_v9 = vadd.f32 %v2524_v21, %v1004_v0  ;;  %1670 = vmatprep.mubr.bf16.mxu1 %v1080_v26  ;;  %v1068_v23 = vadd.f32 %v1052_v27, %v2461_v49  ;;  %v1070_v34 = vadd.f32 %v1054_v10, %v2468_v53 }
 0x352   : > { %v1648_v22 = vpop.f32.mrf.mxu0  ;;  %1671 = vmatmul.mubr.bf16.vlgmr.msra.gmra.mxu1 %v1081_v63 }
 0x353   : > { %v1053_v15 = vmul.f32 %v1005_v9, %v2279_v29  ;;  %v1071_v12 = vadd.f32 %v1055_v6, %v2458_v43  ;;  %v1026_v48 = vadd.f32 %v1648_v22, %v2524_v21 }
 0x354   : > { %v1017_v2 = vpop.f32.mrf.mxu0 }
 0x355   : > { %v1069_v52 = vadd.f32 %v1053_v15, %v2464_v50  ;;  %v1018_v32 = vadd.f32 %v2524_v21, %v1017_v2  ;;  %v1083_v20 = vpack.c.bf16 %v1071_v12, %v1070_v34  ;;  %v1058_v50 = vmul.f32 %v1026_v48, %v2305_v42 }
 0x356   : > { %v1649_v51 = vpop.f32.mrf.mxu0 }
 0x357   : > { %v1029_v36 = vadd.f32 %v1649_v51, %v2524_v21  ;;  %v1082_v18 = vpack.c.bf16 %v1069_v52, %v1068_v23  ;;  %v1056_v29 = vmul.f32 %v1018_v32, %v2297_v38 }
 0x358   : > { %v1020_v19 = vpop.f32.mrf.mxu0 }
 0x359   : > { %v1059_v43 = vmul.f32 %v1029_v36, %v2301_v40  ;;  %v1021_v49 = vadd.f32 %v2524_v21, %v1020_v19  ;;  %1674 = vmatprep.mubr.bf16.mxu1 %v1082_v18  ;;  %v1072_v31 = vadd.f32 %v1056_v29, %v2485_v5  ;;  %v1074_v40 = vadd.f32 %v1058_v50, %v2492_v16 }
 0x35a   : > { %v1652_v54 = vpop.f32.mrf.mxu0  ;;  %1675 = vmatmul.mubr.bf16.gmra.mxu1 %v1083_v20 }
 0x35b   : > { %v1057_v53 = vmul.f32 %v1021_v49, %v2291_v35  ;;  %v1075_v55 = vadd.f32 %v1059_v43, %v2482_v3  ;;  %v1042_v37 = vadd.f32 %v1652_v54, %v2524_v21 }
 0x35c   : > { %v1033_v56 = vpop.f32.mrf.mxu0 }
 0x35d   : > { %v1073_v57 = vadd.f32 %v1057_v53, %v2488_v7  ;;  %v1034_v38 = vadd.f32 %v2524_v21, %v1033_v56  ;;  %v1085_v45 = vpack.c.bf16 %v1075_v55, %v1074_v40  ;;  %v1062_v7 = vmul.f32 %v1042_v37, %v2315_v47 }
 0x35e   : > { %v1653_v39 = vpop.f32.mrf.mxu0 }
 0x35f   : > { %v1045_v42 = vadd.f32 %v1653_v39, %v2524_v21  ;;  %v1084_v58 = vpack.c.bf16 %v1073_v57, %v1072_v31  ;;  %v1060_v35 = vmul.f32 %v1034_v38, %v2309_v44  ;;  %v1078_v14 = vadd.f32 %v1062_v7, %v2515_v33 }
 0x360   : > { %v1036_v60 = vpop.f32.mrf.mxu0 }
 0x361   : > { %v1063_v3 = vmul.f32 %v1045_v42, %v2313_v46  ;;  %v1037_v5 = vadd.f32 %v2524_v21, %v1036_v60  ;;  %1678 = vmatprep.mubr.bf16.mxu1 %v1084_v58  ;;  %v1076_v1 = vadd.f32 %v1060_v35, %v2509_v13  ;;  %v1463_v46 = vld [vmem:[%s2656_s5] ss:$0 sm:$0xff] }
 0x362   : > { %1679 = vmatmul.mubr.bf16.gmra.mxu1 %v1085_v45 }
 0x363   : > { %v1061_v16 = vmul.f32 %v1037_v5, %v2303_v41  ;;  %v1079_v62 = vadd.f32 %v1063_v3, %v2506_v24 }
 0x365   : > { %v1077_v4 = vadd.f32 %v1061_v16, %v2512_v30  ;;  %v1087_v44 = vpack.c.bf16 %v1079_v62, %v1078_v14 }
 0x367   : > { %v1086_v17 = vpack.c.bf16 %v1077_v4, %v1076_v1 }
 0x369   : > { %1682 = vmatprep.mubr.bf16.mxu1 %v1086_v17 }
 0x36a   : > { %1683 = vmatmul.mubr.bf16.gmra.mxu1 %v1087_v44 }
 0x412   : > { %v1672_v47 = vpop.f32.mrf.mxu1 }
 0x413   : > { %v1202_v21 = vadd.f32 %v1672_v47, %v1463_v46 }
 0x414   : > { %v1193_v41 = vpop.f32.mrf.mxu1 }
 0x415   : > { %1472 = vst [vmem:[%s2578_s10 + $0x10] sm:$0xff] %v1202_v21  ;;  %v1194_v24 = vadd.f32 %v1463_v46, %v1193_v41 }
 0x416   : > { %v1673_v13 = vpop.f32.mrf.mxu1 }
 0x417   : > { %1256 = vst [vmem:[%s2578_s10] sm:$0xff] %v1194_v24  ;;  %v1205_v30 = vadd.f32 %v1673_v13, %v1463_v46 }
 0x418   : > { %v1196_v33 = vpop.f32.mrf.mxu1 }
 0x419   : > { %1473 = vst [vmem:[%s2578_s10 + $0x18] sm:$0xff] %v1205_v30  ;;  %v1197_v59 = vadd.f32 %v1463_v46, %v1196_v33 }
 0x41a   : > { %v1676_v8 = vpop.f32.mrf.mxu1 }
 0x41b   : > { %1257 = vst [vmem:[%s2578_s10 + $0x8] sm:$0xff] %v1197_v59  ;;  %v1218_v25 = vadd.f32 %v1676_v8, %v1463_v46 }
 0x41c   : > { %v1209_v28 = vpop.f32.mrf.mxu1 }
 0x41d   : > { %1476 = vst [vmem:[%s2578_s10 + $0x30] sm:$0xff] %v1218_v25  ;;  %v1210_v61 = vadd.f32 %v1463_v46, %v1209_v28 }
 0x41e   : > { %v1677_v11 = vpop.f32.mrf.mxu1 }
 0x41f   : > { %1474 = vst [vmem:[%s2578_s10 + $0x20] sm:$0xff] %v1210_v61  ;;  %v1221_v26 = vadd.f32 %v1677_v11, %v1463_v46 }
 0x420   : > { %v1212_v63 = vpop.f32.mrf.mxu1 }
 0x421   : > { %1477 = vst [vmem:[%s2578_s10 + $0x38] sm:$0xff] %v1221_v26  ;;  %v1213_v0 = vadd.f32 %v1463_v46, %v1212_v63 }
 0x422   : > { %v1680_v27 = vpop.f32.mrf.mxu1 }
 0x423   : > { %1475 = vst [vmem:[%s2578_s10 + $0x28] sm:$0xff] %v1213_v0  ;;  %v1234_v6 = vadd.f32 %v1680_v27, %v1463_v46 }
 0x424   : > { %v1225_v9 = vpop.f32.mrf.mxu1 }
 0x425   : > { %1480 = vst [vmem:[%s2578_s10 + $0x50] sm:$0xff] %v1234_v6  ;;  %v1226_v10 = vadd.f32 %v1463_v46, %v1225_v9 }
 0x426   : > { %v1681_v22 = vpop.f32.mrf.mxu1 }
 0x427   : > { %1478 = vst [vmem:[%s2578_s10 + $0x40] sm:$0xff] %v1226_v10  ;;  %v1237_v15 = vadd.f32 %v1681_v22, %v1463_v46 }
 0x428   : > { %v1228_v12 = vpop.f32.mrf.mxu1 }
 0x429   : > { %1481 = vst [vmem:[%s2578_s10 + $0x58] sm:$0xff] %v1237_v15  ;;  %v1229_v2 = vadd.f32 %v1463_v46, %v1228_v12 }
 0x42a   : > { %v1684_v23 = vpop.f32.mrf.mxu1 }
 0x42b   : > { %1479 = vst [vmem:[%s2578_s10 + $0x48] sm:$0xff] %v1229_v2  ;;  %v1250_v52 = vadd.f32 %v1684_v23, %v1463_v46 }
 0x42c   : > { %v1241_v32 = vpop.f32.mrf.mxu1 }
 0x42d   : > { %1484 = vst [vmem:[%s2578_s10 + $0x70] sm:$0xff] %v1250_v52  ;;  %v1242_v34 = vadd.f32 %v1463_v46, %v1241_v32 }
 0x42e   : > { %v1685_v48 = vpop.f32.mrf.mxu1 }
 0x42f   : > { %1482 = vst [vmem:[%s2578_s10 + $0x60] sm:$0xff] %v1242_v34  ;;  %v1253_v51 = vadd.f32 %v1685_v48, %v1463_v46 }
 0x430   : > { %v1244_v36 = vpop.f32.mrf.mxu1 }
 0x431   : > { %1485 = vst [vmem:[%s2578_s10 + $0x78] sm:$0xff] %v1253_v51  ;;  %v1245_v18 = vadd.f32 %v1463_v46, %v1244_v36 }
 0x433   : > { %1483 = vst [vmem:[%s2578_s10 + $0x68] sm:$0xff] %v1245_v18 }
 0x434   : > { %1938 = shalt.err (!%p1935_p9)
}
 0x435   : > { %s1939_s7 = scalar_lea.hbm %s2599_s15, 2048  ;;  %s1943_s17 = scalar_lea.hbm %s2657_s6, 4096 }
 0x436   : > { %p1940_p13 = scmp.ne.s32.totalorder %s2599_s15, %s1939_s7  ;;  %p1944_p5 = scmp.lt.s32.totalorder %s2599_s15, %s2657_s6 }
 0x437   : > { %p1945_p10 = scmp.lt.s32.totalorder %s1943_s17, %s1939_s7 }
 0x438   : > { %p1941_p12 = pnand %p1940_p13, %p2169_p6 }
 0x439   : > { %p1946_p11 = por %p1945_p10, %p1944_p5 }
 0x43a   : > { %p1942_p0 = pneg %p1941_p12 }
 0x43c   : > { %p1947_p8 = pnand %p1946_p11, %p1942_p0 }
 0x43e   : > { %1950 = shalt.err (!%p1947_p8)
}
 0x43f   : > { %s2026_s10 = smov 128   ;;  %s2027_s19 = smov 8  }
 0x440   : > { %1700 = dma.vmem_to_hbm [thread:$0]  (%p2169_p6), %s2601_s11, 2048, %s2599_s15, %s1280_s1, %s2026_s10, %s2026_s10, %s2027_s19  }
 0x441 PF: > { %s1311_s27 = sand.u32 1, %s1993_s21   ;;  %p2678_p3 = scmp.ne.s32.totalorder %s2667_s8, 0 }
 0x442   : > { %p2679_p2 = scmp.ge.s32.totalorder %s2013_s26, 2  ;;  %s1312_s28 = scalar_lea.sflag [#allocation5], %s1311_s27 }
 0x444   : > { %p1717_p1 = pnand %p2679_p2, %p2678_p3 }
 0x446   : > { %p1718_p4 = pneg %p1717_p1 }
 0x448   : > { %1988 = dma.done.wait (%p1718_p4), %s1312_s28, 2048  }
 0x449   : > { %1990 = vsyncadd (%p1718_p4), %s1312_s28, 4294965248  ;;  %s24_s26 = sadd.s32 1, %s2013_s26   ;;  %s2680_s21 = smov %s1997_s22 }
 0x44a   : > { %p21_p7 = scmp.ge.s32.totalorder %s24_s26, 4   ;;  %s2681_s22 = smov %s2001_s23 }
 0x44b   : > { %s2682_s23 = smov %s2178_s13  ;;  %s2683_s24 = smov %s2009_s25 }
 0x44c   : > { %s2684_s25 = smov %s2686_s14  ;;  %23 = sbr.rel (!%p21_p7) target bundleno = 12 (0xc), region = 113 }
 0x451   :  { %1317 = vsyncpa [#allocation4], 1 }
 0x452   :  { %1319 = vsyncpa [#allocation4 + $0x1], 1 }
 0x453   :  { %1320 = vsyncpa [#allocation7], 1 }
 0x454   :  { %1321 = vsyncpa [#allocation10], 1 }
 0x455   :  { %1322 = vsyncpa [#allocation5], 1 }
 0x456   :  { %1324 = vsyncpa [#allocation5 + $0x1], 1 }

</bundles_post_ra>
